<compile_context>
chip_gen: v7x
topology: tpu7x:2x2x1
jax: 0.10.0
libtpu: 0.0.40
codegen_flags: <defaults>
</compile_context>

<pallas_src>
import functools

import jax
import jax.numpy as jnp
from jax import lax
from jax.experimental import pallas as pl
from jax.experimental.pallas import tpu as pltpu

NEG_SLOPE = 0.01   # nn.LeakyReLU() default (the given module uses the default)
BN_EPS = 1e-5      # nn.BatchNorm2d default


def _round_up(x, m):
    return (x + m - 1) // m * m


def scale_prediction_kernel(x_ref, w1_ref, b1_ref, w2_ref, b2_ref, o_ref,
                            acc_ref, *, h, wp2):
    # x_ref:   (1, Nflat, tk)    bf16 flattened spatially-padded NHWC slab
    # w1_ref:  (9, tk, C2)       bf16 3x3 weights with BN scale folded in
    # b1_ref:  (1, C2)           f32 folded BN bias
    # w2_ref:  (C2, Cout_pad)    bf16 1x1 weights (lane-padded to 128 multiple)
    # b2_ref:  (1, Cout_pad)     f32 1x1 bias (lane-padded)
    # o_ref:   (1, L, Cout_pad)  f32 output, L = H*(W+2); junk cols dropped later
    # acc_ref: (L, C2)           f32 accumulator, persists across Cin tiles
    k = pl.program_id(1)
    L = h * wp2

    @pl.when(k == 0)
    def _():
        acc_ref[...] = jnp.zeros_like(acc_ref)

    # 3x3 conv (pad=1) = 9 shifted (L, tk) x (tk, C2) matmuls over the flat
    # slab; offsets are static, so each tap is a plain sublane-offset load.
    part = None
    for t in range(9):
        ky, kx = divmod(t, 3)
        off = ky * wp2 + kx
        patch = x_ref[0, pl.ds(off, L), :]            # (L, tk) bf16
        c = jnp.dot(patch, w1_ref[t], preferred_element_type=jnp.float32)
        part = c if part is None else part + c
    acc_ref[...] += part                              # single RMW pass per tile

    # Last Cin tile: BN bias + LeakyReLU (f32), 1x1 conv, lane-dense store.
    @pl.when(k == pl.num_programs(1) - 1)
    def _():
        y = acc_ref[...] + b1_ref[...]
        y = jnp.where(y > 0, y, NEG_SLOPE * y)
        z = jnp.dot(y.astype(jnp.bfloat16), w2_ref[...],
                    preferred_element_type=jnp.float32) + b2_ref[...]
        o_ref[0] = z


def scale_prediction_forward(x_nchw, params, num_classes):
    B, Cin, H, W = x_nchw.shape
    C2 = Cin * 2
    Cout = (num_classes + 5) * 3
    Cout_pad = _round_up(Cout, 128)
    Wp2 = W + 2
    L = H * Wp2

    # Cin-reduction tile so deep-head 3x3 weights fit / pipeline in VMEM.
    if Cin % 256 == 0:
        tk = 256
    elif Cin % 128 == 0:
        tk = 128
    else:
        tk = Cin
    num_k = Cin // tk

    # Fold BN (inference) scale into the 3x3 weights; keep only the bias.
    inv_std = 1.0 / jnp.sqrt(params["var"] + BN_EPS)
    s1 = params["gamma"] * inv_std                                   # (C2,)
    b1 = (params["beta"] - params["mean"] * s1).reshape(1, C2).astype(jnp.float32)
    w1_f = (params["w1"] * s1).reshape(9, Cin, C2).astype(jnp.bfloat16)

    # Lane-pad the 1x1 conv so the output store is a full-lane (128x) store.
    w2_p = jnp.zeros((C2, Cout_pad), jnp.float32).at[:, :Cout].set(params["w2"])
    w2_p = w2_p.astype(jnp.bfloat16)
    b2_p = jnp.zeros((1, Cout_pad), jnp.float32).at[0, :Cout].set(params["b2"])

    # NCHW -> NHWC, 1px halo, flatten, bf16.  XLA fuses transpose+pad+cast into
    # one pass over the activation (the transpose pass is mandatory anyway).
    x_nhwc = jnp.transpose(x_nchw, (0, 2, 3, 1))
    x_pad = jnp.pad(x_nhwc, ((0, 0), (1, 1), (1, 1), (0, 0)))
    n_img = (H + 2) * Wp2
    Nflat = _round_up(n_img + 2, 8)                 # +2: max tap-offset overrun
    x_flat = jnp.pad(x_pad.reshape(B, n_img, Cin),
                     ((0, 0), (0, Nflat - n_img), (0, 0))).astype(jnp.bfloat16)

    kernel = functools.partial(scale_prediction_kernel, h=H, wp2=Wp2)

    out_flat = pl.pallas_call(
        kernel,
        out_shape=jax.ShapeDtypeStruct((B, L, Cout_pad), jnp.float32),
        grid_spec=pltpu.PrefetchScalarGridSpec(
            num_scalar_prefetch=0,
            grid=(B, num_k),
            in_specs=[
                pl.BlockSpec((1, Nflat, tk), lambda b, k: (b, 0, k)),
                pl.BlockSpec((9, tk, C2), lambda b, k: (0, k, 0)),
                pl.BlockSpec((1, C2), lambda b, k: (0, 0)),
                pl.BlockSpec((C2, Cout_pad), lambda b, k: (0, 0)),
                pl.BlockSpec((1, Cout_pad), lambda b, k: (0, 0)),
            ],
            out_specs=pl.BlockSpec((1, L, Cout_pad), lambda b, k: (b, 0, 0)),
            scratch_shapes=[pltpu.VMEM((L, C2), jnp.float32)],
        ),
        compiler_params=pltpu.CompilerParams(
            dimension_semantics=("parallel", "arbitrary"),
            vmem_limit_bytes=64 * 1024 * 1024,
        ),
    )(x_flat, w1_f, b1, w2_p, b2_p)

    # Drop the 2 junk (halo) columns per row and the lane padding, then match
    # torch: reshape(B, 3, nc+5, H, W).permute(0,1,3,4,2) == NHWC reshape+transpose.
    out = out_flat.reshape(B, H, Wp2, Cout_pad)[:, :, :W, :Cout]
    out = out.reshape(B, H, W, 3, num_classes + 5)
    return jnp.transpose(out, (0, 3, 1, 2, 4))


def reference_forward(x_nchw, params, num_classes):
    # Pure-JAX f32 reference (XLA conv) for correctness checking.
    x = jnp.transpose(x_nchw, (0, 2, 3, 1)).astype(jnp.float32)
    y = lax.conv_general_dilated(
        x, params["w1"], window_strides=(1, 1), padding="SAME",
        dimension_numbers=("NHWC", "HWIO", "NHWC"),
        precision=lax.Precision.HIGHEST)
    y = (y - params["mean"]) / jnp.sqrt(params["var"] + BN_EPS)
    y = y * params["gamma"] + params["beta"]
    y = jnp.where(y > 0, y, NEG_SLOPE * y)
    z = jnp.einsum("bhwc,co->bhwo", y, params["w2"],
                   precision=lax.Precision.HIGHEST) + params["b2"]
    B, H, W = x.shape[0], x.shape[1], x.shape[2]
    out = z.reshape(B, H, W, 3, num_classes + 5)
    return jnp.transpose(out, (0, 3, 1, 2, 4))


def make_params(key, channels, num_classes):
    C2 = channels * 2
    Cout = (num_classes + 5) * 3
    ks = jax.random.split(key, 7)
    return {
        "w1":    0.1 * jax.random.normal(ks[0], (3, 3, channels, C2), jnp.float32),
        "gamma": 1.0 + 0.1 * jax.random.normal(ks[1], (C2,), jnp.float32),
        "beta":  0.1 * jax.random.normal(ks[2], (C2,), jnp.float32),
        "mean":  0.1 * jax.random.normal(ks[3], (C2,), jnp.float32),
        "var":   0.5 + jnp.abs(jax.random.normal(ks[4], (C2,), jnp.float32)),
        "w2":    0.1 * jax.random.normal(ks[5], (C2, Cout), jnp.float32),
        "b2":    0.1 * jax.random.normal(ks[6], (Cout,), jnp.float32),
    }


if __name__ == "__main__":
    B, C, H, W = 2, 8, 16, 16
    num_classes = 3

    key = jax.random.PRNGKey(0)
    kx, kp = jax.random.split(key)
    x = jax.random.normal(kx, (B, C, H, W), jnp.float32)   # PyTorch-style NCHW
    params = make_params(kp, C, num_classes)

    out = scale_prediction_forward(x, params, num_classes)
    out = jax.block_until_ready(out)

    expected_shape = (B, 3, H, W, num_classes + 5)
    assert out.shape == expected_shape, (out.shape, expected_shape)

    ref = jax.block_until_ready(reference_forward(x, params, num_classes))
    # bf16 matmul operands with f32 accumulation vs a full-f32 reference.
    assert jnp.allclose(out, ref, atol=2e-2, rtol=2e-2), (
        float(jnp.max(jnp.abs(out - ref))))

    print("KERNEL_OK")
</pallas_src>

<mosaic_0001>
module attributes {stable_mosaic.version = 11 : i64} {
  func.func @scale_prediction_kernel(%arg0: i32, %arg1: i32, %arg2: memref<1x328x8xbf16, #tpu.memory_space<vmem>>, %arg3: memref<9x8x16xbf16, #tpu.memory_space<vmem>>, %arg4: memref<1x16xf32, #tpu.memory_space<vmem>>, %arg5: memref<16x128xbf16, #tpu.memory_space<vmem>>, %arg6: memref<1x128xf32, #tpu.memory_space<vmem>>, %arg7: memref<1x288x128xf32, #tpu.memory_space<vmem>>, %arg8: memref<288x16xf32, #tpu.memory_space<vmem>>) attributes {dimension_semantics = [#tpu.dimension_semantics<parallel>, #tpu.dimension_semantics<arbitrary>], iteration_bounds = array<i64: 2, 1>, scalar_prefetch = 0 : i64, scratch_operands = 1 : i64, tpu.core_type = #tpu.core_type<tc>, window_params = [{transform_indices = @transform_0, window_bounds = array<i64: 1, 328, 8>}, {transform_indices = @transform_1, window_bounds = array<i64: 9, 8, 16>}, {pipeline_mode = #tpu.pipeline_mode<synchronous>, transform_indices = @transform_2, window_bounds = array<i64: 1, 16>}, {pipeline_mode = #tpu.pipeline_mode<synchronous>, transform_indices = @transform_3, window_bounds = array<i64: 16, 128>}, {pipeline_mode = #tpu.pipeline_mode<synchronous>, transform_indices = @transform_4, window_bounds = array<i64: 1, 128>}, {transform_indices = @transform_5, window_bounds = array<i64: 1, 288, 128>}]} {
    %c0_i32 = arith.constant 0 : i32
    %0 = arith.cmpi eq, %arg1, %c0_i32 : i32
    %1 = arith.extui %0 : i1 to i32
    %c0_i32_0 = arith.constant 0 : i32
    %2 = arith.cmpi ne, %1, %c0_i32_0 : i32
    scf.if %2 {
      %cst_54 = arith.constant 0.000000e+00 : f32
      %62 = vector.broadcast %cst_54 : f32 to vector<288x16xf32>
      %c0_55 = arith.constant 0 : index
      %c0_56 = arith.constant 0 : index
      %63 = vector.load %arg8[%c0_55, %c0_56] : memref<288x16xf32, #tpu.memory_space<vmem>>, vector<288x16xf32>
      tpu.vector_store %arg8[%c0_55, %c0_56], %62 {strides = array<i32>} : memref<288x16xf32, #tpu.memory_space<vmem>>, vector<288x16xf32>,
    } else {
    }
    %c0 = arith.constant 0 : index
    %c0_1 = arith.constant 0 : index
    %c0_2 = arith.constant 0 : index
    %3 = vector.load %arg2[%c0, %c0_1, %c0_2] : memref<1x328x8xbf16, #tpu.memory_space<vmem>>, vector<1x288x8xbf16>
    %4 = vector.shape_cast %3 : vector<1x288x8xbf16> to vector<288x8xbf16>
    %c0_3 = arith.constant 0 : index
    %c0_4 = arith.constant 0 : index
    %c0_5 = arith.constant 0 : index
    %5 = vector.load %arg3[%c0_3, %c0_4, %c0_5] : memref<9x8x16xbf16, #tpu.memory_space<vmem>>, vector<1x8x16xbf16>
    %6 = vector.shape_cast %5 : vector<1x8x16xbf16> to vector<8x16xbf16>
    %cst = arith.constant dense<0.000000e+00> : vector<288x16xf32>
    %7 = tpu.matmul %4, %6, %cst {dimension_numbers = #tpu.dot_dimension_numbers<[1], [0], [0], [1], [0, 0, 1, 1], [], []>} : vector<288x8xbf16>, vector<8x16xbf16>, vector<288x16xf32> -> vector<288x16xf32>
    %c0_6 = arith.constant 0 : index
    %c1 = arith.constant 1 : index
    %c0_7 = arith.constant 0 : index
    %8 = vector.load %arg2[%c0_6, %c1, %c0_7] : memref<1x328x8xbf16, #tpu.memory_space<vmem>>, vector<1x288x8xbf16>
    %9 = vector.shape_cast %8 : vector<1x288x8xbf16> to vector<288x8xbf16>
    %c1_8 = arith.constant 1 : index
    %c0_9 = arith.constant 0 : index
    %c0_10 = arith.constant 0 : index
    %10 = vector.load %arg3[%c1_8, %c0_9, %c0_10] : memref<9x8x16xbf16, #tpu.memory_space<vmem>>, vector<1x8x16xbf16>
    %11 = vector.shape_cast %10 : vector<1x8x16xbf16> to vector<8x16xbf16>
    %cst_11 = arith.constant dense<0.000000e+00> : vector<288x16xf32>
    %12 = tpu.matmul %9, %11, %cst_11 {dimension_numbers = #tpu.dot_dimension_numbers<[1], [0], [0], [1], [0, 0, 1, 1], [], []>} : vector<288x8xbf16>, vector<8x16xbf16>, vector<288x16xf32> -> vector<288x16xf32>
    %13 = arith.addf %7, %12 : vector<288x16xf32>
    %c0_12 = arith.constant 0 : index
    %c2 = arith.constant 2 : index
    %c0_13 = arith.constant 0 : index
    %14 = vector.load %arg2[%c0_12, %c2, %c0_13] : memref<1x328x8xbf16, #tpu.memory_space<vmem>>, vector<1x288x8xbf16>
    %15 = vector.shape_cast %14 : vector<1x288x8xbf16> to vector<288x8xbf16>
    %c2_14 = arith.constant 2 : index
    %c0_15 = arith.constant 0 : index
    %c0_16 = arith.constant 0 : index
    %16 = vector.load %arg3[%c2_14, %c0_15, %c0_16] : memref<9x8x16xbf16, #tpu.memory_space<vmem>>, vector<1x8x16xbf16>
    %17 = vector.shape_cast %16 : vector<1x8x16xbf16> to vector<8x16xbf16>
    %cst_17 = arith.constant dense<0.000000e+00> : vector<288x16xf32>
    %18 = tpu.matmul %15, %17, %cst_17 {dimension_numbers = #tpu.dot_dimension_numbers<[1], [0], [0], [1], [0, 0, 1, 1], [], []>} : vector<288x8xbf16>, vector<8x16xbf16>, vector<288x16xf32> -> vector<288x16xf32>
    %19 = arith.addf %13, %18 : vector<288x16xf32>
    %c0_18 = arith.constant 0 : index
    %c18 = arith.constant 18 : index
    %c0_19 = arith.constant 0 : index
    %20 = vector.load %arg2[%c0_18, %c18, %c0_19] : memref<1x328x8xbf16, #tpu.memory_space<vmem>>, vector<1x288x8xbf16>
    %21 = vector.shape_cast %20 : vector<1x288x8xbf16> to vector<288x8xbf16>
    %c3 = arith.constant 3 : index
    %c0_20 = arith.constant 0 : index
    %c0_21 = arith.constant 0 : index
    %22 = vector.load %arg3[%c3, %c0_20, %c0_21] : memref<9x8x16xbf16, #tpu.memory_space<vmem>>, vector<1x8x16xbf16>
    %23 = vector.shape_cast %22 : vector<1x8x16xbf16> to vector<8x16xbf16>
    %cst_22 = arith.constant dense<0.000000e+00> : vector<288x16xf32>
    %24 = tpu.matmul %21, %23, %cst_22 {dimension_numbers = #tpu.dot_dimension_numbers<[1], [0], [0], [1], [0, 0, 1, 1], [], []>} : vector<288x8xbf16>, vector<8x16xbf16>, vector<288x16xf32> -> vector<288x16xf32>
    %25 = arith.addf %19, %24 : vector<288x16xf32>
    %c0_23 = arith.constant 0 : index
    %c19 = arith.constant 19 : index
    %c0_24 = arith.constant 0 : index
    %26 = vector.load %arg2[%c0_23, %c19, %c0_24] : memref<1x328x8xbf16, #tpu.memory_space<vmem>>, vector<1x288x8xbf16>
    %27 = vector.shape_cast %26 : vector<1x288x8xbf16> to vector<288x8xbf16>
    %c4 = arith.constant 4 : index
    %c0_25 = arith.constant 0 : index
    %c0_26 = arith.constant 0 : index
    %28 = vector.load %arg3[%c4, %c0_25, %c0_26] : memref<9x8x16xbf16, #tpu.memory_space<vmem>>, vector<1x8x16xbf16>
    %29 = vector.shape_cast %28 : vector<1x8x16xbf16> to vector<8x16xbf16>
    %cst_27 = arith.constant dense<0.000000e+00> : vector<288x16xf32>
    %30 = tpu.matmul %27, %29, %cst_27 {dimension_numbers = #tpu.dot_dimension_numbers<[1], [0], [0], [1], [0, 0, 1, 1], [], []>} : vector<288x8xbf16>, vector<8x16xbf16>, vector<288x16xf32> -> vector<288x16xf32>
    %31 = arith.addf %25, %30 : vector<288x16xf32>
    %c0_28 = arith.constant 0 : index
    %c20 = arith.constant 20 : index
    %c0_29 = arith.constant 0 : index
    %32 = vector.load %arg2[%c0_28, %c20, %c0_29] : memref<1x328x8xbf16, #tpu.memory_space<vmem>>, vector<1x288x8xbf16>
    %33 = vector.shape_cast %32 : vector<1x288x8xbf16> to vector<288x8xbf16>
    %c5 = arith.constant 5 : index
    %c0_30 = arith.constant 0 : index
    %c0_31 = arith.constant 0 : index
    %34 = vector.load %arg3[%c5, %c0_30, %c0_31] : memref<9x8x16xbf16, #tpu.memory_space<vmem>>, vector<1x8x16xbf16>
    %35 = vector.shape_cast %34 : vector<1x8x16xbf16> to vector<8x16xbf16>
    %cst_32 = arith.constant dense<0.000000e+00> : vector<288x16xf32>
    %36 = tpu.matmul %33, %35, %cst_32 {dimension_numbers = #tpu.dot_dimension_numbers<[1], [0], [0], [1], [0, 0, 1, 1], [], []>} : vector<288x8xbf16>, vector<8x16xbf16>, vector<288x16xf32> -> vector<288x16xf32>
    %37 = arith.addf %31, %36 : vector<288x16xf32>
    %c0_33 = arith.constant 0 : index
    %c36 = arith.constant 36 : index
    %c0_34 = arith.constant 0 : index
    %38 = vector.load %arg2[%c0_33, %c36, %c0_34] : memref<1x328x8xbf16, #tpu.memory_space<vmem>>, vector<1x288x8xbf16>
    %39 = vector.shape_cast %38 : vector<1x288x8xbf16> to vector<288x8xbf16>
    %c6 = arith.constant 6 : index
    %c0_35 = arith.constant 0 : index
    %c0_36 = arith.constant 0 : index
    %40 = vector.load %arg3[%c6, %c0_35, %c0_36] : memref<9x8x16xbf16, #tpu.memory_space<vmem>>, vector<1x8x16xbf16>
    %41 = vector.shape_cast %40 : vector<1x8x16xbf16> to vector<8x16xbf16>
    %cst_37 = arith.constant dense<0.000000e+00> : vector<288x16xf32>
    %42 = tpu.matmul %39, %41, %cst_37 {dimension_numbers = #tpu.dot_dimension_numbers<[1], [0], [0], [1], [0, 0, 1, 1], [], []>} : vector<288x8xbf16>, vector<8x16xbf16>, vector<288x16xf32> -> vector<288x16xf32>
    %43 = arith.addf %37, %42 : vector<288x16xf32>
    %c0_38 = arith.constant 0 : index
    %c37 = arith.constant 37 : index
    %c0_39 = arith.constant 0 : index
    %44 = vector.load %arg2[%c0_38, %c37, %c0_39] : memref<1x328x8xbf16, #tpu.memory_space<vmem>>, vector<1x288x8xbf16>
    %45 = vector.shape_cast %44 : vector<1x288x8xbf16> to vector<288x8xbf16>
    %c7 = arith.constant 7 : index
    %c0_40 = arith.constant 0 : index
    %c0_41 = arith.constant 0 : index
    %46 = vector.load %arg3[%c7, %c0_40, %c0_41] : memref<9x8x16xbf16, #tpu.memory_space<vmem>>, vector<1x8x16xbf16>
    %47 = vector.shape_cast %46 : vector<1x8x16xbf16> to vector<8x16xbf16>
    %cst_42 = arith.constant dense<0.000000e+00> : vector<288x16xf32>
    %48 = tpu.matmul %45, %47, %cst_42 {dimension_numbers = #tpu.dot_dimension_numbers<[1], [0], [0], [1], [0, 0, 1, 1], [], []>} : vector<288x8xbf16>, vector<8x16xbf16>, vector<288x16xf32> -> vector<288x16xf32>
    %49 = arith.addf %43, %48 : vector<288x16xf32>
    %c0_43 = arith.constant 0 : index
    %c38 = arith.constant 38 : index
    %c0_44 = arith.constant 0 : index
    %50 = vector.load %arg2[%c0_43, %c38, %c0_44] : memref<1x328x8xbf16, #tpu.memory_space<vmem>>, vector<1x288x8xbf16>
    %51 = vector.shape_cast %50 : vector<1x288x8xbf16> to vector<288x8xbf16>
    %c8 = arith.constant 8 : index
    %c0_45 = arith.constant 0 : index
    %c0_46 = arith.constant 0 : index
    %52 = vector.load %arg3[%c8, %c0_45, %c0_46] : memref<9x8x16xbf16, #tpu.memory_space<vmem>>, vector<1x8x16xbf16>
    %53 = vector.shape_cast %52 : vector<1x8x16xbf16> to vector<8x16xbf16>
    %cst_47 = arith.constant dense<0.000000e+00> : vector<288x16xf32>
    %54 = tpu.matmul %51, %53, %cst_47 {dimension_numbers = #tpu.dot_dimension_numbers<[1], [0], [0], [1], [0, 0, 1, 1], [], []>} : vector<288x8xbf16>, vector<8x16xbf16>, vector<288x16xf32> -> vector<288x16xf32>
    %55 = arith.addf %49, %54 : vector<288x16xf32>
    %c0_48 = arith.constant 0 : index
    %c0_49 = arith.constant 0 : index
    %56 = vector.load %arg8[%c0_48, %c0_49] : memref<288x16xf32, #tpu.memory_space<vmem>>, vector<288x16xf32>
    %57 = arith.addf %56, %55 : vector<288x16xf32>
    %c0_50 = arith.constant 0 : index
    %c0_51 = arith.constant 0 : index
    %58 = vector.load %arg8[%c0_50, %c0_51] : memref<288x16xf32, #tpu.memory_space<vmem>>, vector<288x16xf32>
    tpu.vector_store %arg8[%c0_50, %c0_51], %57 {strides = array<i32>} : memref<288x16xf32, #tpu.memory_space<vmem>>, vector<288x16xf32>,
    %c0_i32_52 = arith.constant 0 : i32
    %59 = arith.cmpi eq, %arg1, %c0_i32_52 : i32
    %60 = arith.extui %59 : i1 to i32
    %c0_i32_53 = arith.constant 0 : i32
    %61 = arith.cmpi ne, %60, %c0_i32_53 : i32
    scf.if %61 {
      %c0_54 = arith.constant 0 : index
      %c0_55 = arith.constant 0 : index
      %62 = vector.load %arg8[%c0_54, %c0_55] : memref<288x16xf32, #tpu.memory_space<vmem>>, vector<288x16xf32>
      %c0_56 = arith.constant 0 : index
      %c0_57 = arith.constant 0 : index
      %63 = vector.load %arg4[%c0_56, %c0_57] : memref<1x16xf32, #tpu.memory_space<vmem>>, vector<1x16xf32>
      %64 = vector.broadcast %63 : vector<1x16xf32> to vector<288x16xf32>
      %65 = arith.addf %62, %64 : vector<288x16xf32>
      %cst_58 = arith.constant 0.000000e+00 : f32
      %66 = vector.broadcast %cst_58 : f32 to vector<288x16xf32>
      %67 = arith.cmpf ogt, %65, %66 : vector<288x16xf32>
      %cst_59 = arith.constant 0.00999999977 : f32
      %68 = vector.broadcast %cst_59 : f32 to vector<288x16xf32>
      %69 = arith.mulf %68, %65 : vector<288x16xf32>
      %70 = arith.select %67, %65, %69 : vector<288x16xi1>, vector<288x16xf32>
      %71 = arith.truncf %70 : vector<288x16xf32> to vector<288x16xbf16>
      %c0_60 = arith.constant 0 : index
      %c0_61 = arith.constant 0 : index
      %72 = vector.load %arg5[%c0_60, %c0_61] : memref<16x128xbf16, #tpu.memory_space<vmem>>, vector<16x128xbf16>
      %cst_62 = arith.constant dense<0.000000e+00> : vector<288x128xf32>
      %73 = tpu.matmul %71, %72, %cst_62 {dimension_numbers = #tpu.dot_dimension_numbers<[1], [0], [0], [1], [0, 0, 1, 1], [], []>} : vector<288x16xbf16>, vector<16x128xbf16>, vector<288x128xf32> -> vector<288x128xf32>
      %c0_63 = arith.constant 0 : index
      %c0_64 = arith.constant 0 : index
      %74 = vector.load %arg6[%c0_63, %c0_64] : memref<1x128xf32, #tpu.memory_space<vmem>>, vector<1x128xf32>
      %75 = vector.broadcast %74 : vector<1x128xf32> to vector<288x128xf32>
      %76 = arith.addf %73, %75 : vector<288x128xf32>
      %c0_65 = arith.constant 0 : index
      %c0_66 = arith.constant 0 : index
      %c0_67 = arith.constant 0 : index
      %77 = vector.load %arg7[%c0_65, %c0_66, %c0_67] : memref<1x288x128xf32, #tpu.memory_space<vmem>>, vector<1x288x128xf32>
      %78 = vector.shape_cast %77 : vector<1x288x128xf32> to vector<288x128xf32>
      %79 = vector.shape_cast %76 : vector<288x128xf32> to vector<1x288x128xf32>
      tpu.vector_store %arg7[%c0_65, %c0_66, %c0_67], %79 {strides = array<i32>} : memref<1x288x128xf32, #tpu.memory_space<vmem>>, vector<1x288x128xf32>,
    } else {
    }
    return
  }
  func.func @transform_0(%arg0: i32, %arg1: i32) -> (i32, i32, i32) {
    %c0_i32 = arith.constant 0 : i32
    %c0_i32_0 = arith.constant 0 : i32
    return %arg0, %c0_i32, %arg1 : i32, i32, i32
  }
  func.func @transform_1(%arg0: i32, %arg1: i32) -> (i32, i32, i32) {
    %c0_i32 = arith.constant 0 : i32
    %c0_i32_0 = arith.constant 0 : i32
    %c0_i32_1 = arith.constant 0 : i32
    return %c0_i32, %arg1, %c0_i32_0 : i32, i32, i32
  }
  func.func @transform_2(%arg0: i32, %arg1: i32) -> (i32, i32) {
    %c0_i32 = arith.constant 0 : i32
    %c0_i32_0 = arith.constant 0 : i32
    %c0_i32_1 = arith.constant 0 : i32
    return %c0_i32, %c0_i32_0 : i32, i32
  }
  func.func @transform_3(%arg0: i32, %arg1: i32) -> (i32, i32) {
    %c0_i32 = arith.constant 0 : i32
    %c0_i32_0 = arith.constant 0 : i32
    %c0_i32_1 = arith.constant 0 : i32
    return %c0_i32, %c0_i32_0 : i32, i32
  }
  func.func @transform_4(%arg0: i32, %arg1: i32) -> (i32, i32) {
    %c0_i32 = arith.constant 0 : i32
    %c0_i32_0 = arith.constant 0 : i32
    %c0_i32_1 = arith.constant 0 : i32
    return %c0_i32, %c0_i32_0 : i32, i32
  }
  func.func @transform_5(%arg0: i32, %arg1: i32) -> (i32, i32, i32) {
    %c0_i32 = arith.constant 0 : i32
    %c0_i32_0 = arith.constant 0 : i32
    %c0_i32_1 = arith.constant 0 : i32
    return %arg0, %c0_i32, %c0_i32_0 : i32, i32, i32
  }
}

</mosaic_0001>

<bundles_post_ra>
// kernel: tpu_custom_call.1
= control target key start
LH: loop header
LB: loop body
LE: loop exit
PB: predicated region body
PF: predicated region fallthrough
CT: control target
= control target key end

     0   :  { %10 = vsyncpa [#allocation4], 0  ;;  %s7504_s0 = inlined_call_operand.hbm [shape: bf16[2,328,8], index: 0, kind: input, shape index: {}]   ;;  %s7505_s1 = inlined_call_operand.hbm [shape: bf16[9,8,16], index: 1, kind: input, shape index: {}]   ;;  %s7506_s2 = inlined_call_operand.hbm [shape: f32[1,16], index: 2, kind: input, shape index: {}]   ;;  %s7507_s3 = inlined_call_operand.hbm [shape: bf16[16,128], index: 3, kind: input, shape index: {}]   ;;  %s7508_s4 = inlined_call_operand.hbm [shape: f32[1,128], index: 4, kind: input, shape index: {}]   ;;  %s7509_s5 = inlined_call_operand.hbm [shape: f32[2,288,128], index: 5, kind: output, shape index: {}]  }
   0x1   :  { %12 = vsyncpa [#allocation4 + $0x1], 0 }
   0x2   :  { %13 = vsyncpa [#allocation7], 0 }
   0x3   :  { %14 = vsyncpa [#allocation10], 0 }
   0x4   :  { %15 = vsyncpa [#allocation5], 0 }
   0x5   :  { %17 = vsyncpa [#allocation5 + $0x1], 0  ;;  %s6139_s18 = smov 0   ;;  %s6141_s19 = smov 0  }
   0x6   :  { %s6143_s20 = smov 0   ;;  %s6145_s21 = smov 0  }
   0x7   :  { %s6147_s22 = smov 0   ;;  %s6149_s23 = smov 0  }
   0x8 LB: > { %7519 = sst [smem:[#allocation17_spill]] %s6076_s18  ;;  %s4545_s24 = sadd.s32 4294967295, %s6096_s23   ;;  %s6096_s23 = sphi %s6149_s23, %s23_s23   ;;  %s6092_s22 = sphi %s6147_s22, %s7546_s22   ;;  %s6088_s21 = sphi %s6145_s21, %s7545_s21   ;;  %s6084_s20 = sphi %s6143_s20, %s7544_s20   ;;  %s6080_s19 = sphi %s6141_s19, %s7543_s19   ;;  %s6076_s18 = sphi %s6139_s18, %s7542_s18  }
   0x9   : > { %s4546_s25 = sadd.s32 4294967294, %s6096_s23   ;;  %p57_p0 = scmp.ne.s32.totalorder %s6080_s19, %s6076_s18 }
   0xa   : > { %p6173_p1 = scmp.eq.s32.totalorder %s4545_s24, 0  ;;  %p6177_p2 = scmp.eq.s32.totalorder %s4545_s24, 1 }
   0xb   : > { %p176_p3 = scmp.eq.s32.totalorder %s4546_s25, 1  ;;  %p4547_p5 = scmp.ge.s32.totalorder %s6096_s23, 1 }
   0xc   : > { %s7520_s26 = scalar_select %p6173_p1, 1, 0 }
   0xd   : > { %s7521_s27 = scalar_select %p6177_p2, 1, 0 }
   0xe   : > { %p6183_p4 = por %p6173_p1, %p57_p0  ;;  %p6188_p6 = por %p176_p3, %p57_p0 }
   0xf   : > { %p183_p7 = scmp.lt.s32.totalorder %s6096_s23, 3  ;;  %s6098_s6 = smov [#allocation6]  }
  0x10   : > { %s7522_s28 = scalar_select %p6183_p4, 1, 0 }
  0x11   : > { %s7523_s29 = scalar_select %p6188_p6, 1, 0 }
  0x12   : > { %p6193_p8 = pnand %p4547_p5, %p183_p7  ;;  %s197_s7 = sshll.u32 %s6098_s6, 4  ;;  %s6197_s7 = int_to_ptr.vmem [resolvable:$true] %s197_s7 }
  0x13   : > { %7524 = sst [smem:[#allocation18_spill]] %s7523_s29  ;;  %s6099_s9 = smov [#allocation9]  }
  0x14   : > { %s7525_s30 = scalar_select %p6193_p8, 1, 0 }
  0x15   : > { %p5699_p9 = pneg %p6193_p8  ;;  %s221_s10 = sshll.u32 %s6099_s9, 4  ;;  %s6208_s10 = int_to_ptr.vmem [resolvable:$true] %s221_s10 }
  0x16   : > { %s6100_s11 = smov [#allocation8]   ;;  %s5864_s15 = scalar_lea.hbm %s7505_s1, 576 }
  0x17   : > { %p6204_p11 = pnand %p5699_p9, %p6173_p1  ;;  %s6210_s12 = sshll.u32 %s6100_s11, 4  ;;  %s212_s12 = int_to_ptr.vmem [resolvable:$true] %s6210_s12 }
  0x18   : > { %p5865_p12 = scmp.ne.s32.totalorder %s7505_s1, %s5864_s15  ;;  %p5871_p5 = scmp.lt.u32.totalorder %s5864_s15, %s7505_s1 }
  0x19   : > { %p6220_p13 = pneg %p6204_p11 }
  0x1b   : > { %p5867_p0 = pnand %p6220_p13, %p5865_p12 }
  0x1d   : > { %p5868_p3 = pneg %p5867_p0 }
  0x1f   : > { %p5873_p7 = pnand %p5871_p5, %p5868_p3 }
  0x21   : > { %5876 = shalt.err (!%p5873_p7)
}
  0x22   : > { %s5877_s9 = scalar_lea.vmem %s6197_s7, 576  ;;  %p5885_p1 = scmp.lt.s32.totalorder %s6197_s7, %s6197_s7 }
  0x23   : > { %p5878_p9 = scmp.ne.s32.totalorder %s6197_s7, %s5877_s9  ;;  %p5886_p4 = scmp.lt.s32.totalorder %s5877_s9, %s5877_s9 }
  0x25   : > { %p5880_p10 = pnand %p5878_p9, %p6220_p13  ;;  %p5887_p12 = por %p5886_p4, %p5885_p1 }
  0x27   : > { %p5881_p6 = pneg %p5880_p10 }
  0x29   : > { %p5888_p0 = pnand %p5887_p12, %p5881_p6 }
  0x2b   : > { %5891 = shalt.err (!%p5888_p0)
}
  0x2c   : > { %s6101_s11 = smov 64   ;;  %s6102_s13 = smov 4  }
  0x2d   : > { %5702 = dma.hbm_to_vmem [thread:$0]  (!%p6204_p11), %s7505_s1, 576, %s6197_s7, [#allocation7], %s6101_s11, %s6101_s11, %s6102_s13  }
  0x2e   : > { %s5892_s25 = scalar_lea.hbm %s7507_s3, 128 }
  0x2f   : > { %p5893_p1 = scmp.ne.s32.totalorder %s7507_s3, %s5892_s25  ;;  %p5899_p10 = scmp.lt.u32.totalorder %s5892_s25, %s7507_s3 }
  0x31   : > { %p5895_p4 = pnand %p5893_p1, %p6220_p13 }
  0x33   : > { %p5896_p6 = pneg %p5895_p4 }
  0x35   : > { %p5901_p3 = pnand %p5899_p10, %p5896_p6 }
  0x37   : > { %5904 = shalt.err (!%p5901_p3)
}
  0x38   : > { %s5905_s7 = scalar_lea.vmem %s6208_s10, 128  ;;  %p5913_p12 = scmp.lt.s32.totalorder %s6208_s10, %s6208_s10 }
  0x39   : > { %p5906_p5 = scmp.ne.s32.totalorder %s6208_s10, %s5905_s7  ;;  %p5914_p0 = scmp.lt.s32.totalorder %s5905_s7, %s5905_s7 }
  0x3b   : > { %p5908_p7 = pnand %p5906_p5, %p6220_p13  ;;  %p5915_p1 = por %p5914_p0, %p5913_p12 }
  0x3d   : > { %p5909_p9 = pneg %p5908_p7 }
  0x3f   : > { %p5916_p4 = pnand %p5915_p1, %p5909_p9 }
  0x41   : > { %5919 = shalt.err (!%p5916_p4)
}
  0x42   : > { %5708 = dma.hbm_to_vmem [thread:$0]  (!%p6204_p11), %s7507_s3, 128, %s6208_s10, [#allocation10], %s6101_s11, %s6101_s11, %s6102_s13  }
  0x43   : > { %s5920_s16 = scalar_lea.hbm %s7506_s2, 16 }
  0x44   : > { %p5921_p6 = scmp.ne.s32.totalorder %s7506_s2, %s5920_s16  ;;  %p5927_p5 = scmp.lt.u32.totalorder %s5920_s16, %s7506_s2 }
  0x46   : > { %p5923_p10 = pnand %p5921_p6, %p6220_p13 }
  0x48   : > { %p5924_p3 = pneg %p5923_p10 }
  0x4a   : > { %p5929_p7 = pnand %p5927_p5, %p5924_p3 }
  0x4c   : > { %5932 = shalt.err (!%p5929_p7)
}
  0x4d   : > { %s5933_s7 = scalar_lea.vmem %s212_s12, 16  ;;  %s5940_s10 = scalar_lea.vmem %s212_s12, 32 }
  0x4e   : > { %p5934_p9 = scmp.ne.s32.totalorder %s212_s12, %s5933_s7  ;;  %p5941_p1 = scmp.lt.s32.totalorder %s212_s12, %s212_s12 }
  0x4f   : > { %p5942_p4 = scmp.lt.s32.totalorder %s5940_s10, %s5933_s7 }
  0x50   : > { %p5936_p12 = pnand %p5934_p9, %p6220_p13 }
  0x51   : > { %p5943_p8 = por %p5942_p4, %p5941_p1 }
  0x52   : > { %p5937_p0 = pneg %p5936_p12 }
  0x54   : > { %p5944_p2 = pnand %p5943_p8, %p5937_p0 }
  0x56   : > { %5947 = shalt.err (!%p5944_p2)
}
  0x57   : > { %5705 = dma.hbm_to_vmem [thread:$0]  (!%p6204_p11), %s7506_s2, 16, %s212_s12, [#allocation7]  }
  0x58   : > { %s6103_s14 = smov [#allocation11]   ;;  %s5948_s25 = scalar_lea.hbm %s7508_s4, 16 }
  0x59   : > { %s235_s15 = sshll.u32 %s6103_s14, 4  ;;  %p5949_p6 = scmp.ne.s32.totalorder %s7508_s4, %s5948_s25  ;;  %s236_s15 = int_to_ptr.vmem [resolvable:$true] %s235_s15 }
  0x5a   : > { %p5955_p10 = scmp.lt.u32.totalorder %s5948_s25, %s7508_s4 }
  0x5b   : > { %p5951_p2 = pnand %p5949_p6, %p6220_p13 }
  0x5d   : > { %p5952_p8 = pneg %p5951_p2 }
  0x5f   : > { %p5957_p3 = pnand %p5955_p10, %p5952_p8 }
  0x61   : > { %5960 = shalt.err (!%p5957_p3)
}
  0x62   : > { %s5961_s12 = scalar_lea.vmem %s236_s15, 16  ;;  %s5968_s18 = scalar_lea.vmem %s236_s15, 32 }
  0x63   : > { %p5962_p5 = scmp.ne.s32.totalorder %s236_s15, %s5961_s12  ;;  %p5969_p12 = scmp.lt.s32.totalorder %s236_s15, %s236_s15 }
  0x64   : > { %p5970_p0 = scmp.lt.s32.totalorder %s5968_s18, %s5961_s12 }
  0x65   : > { %p5964_p7 = pnand %p5962_p5, %p6220_p13 }
  0x66   : > { %p5971_p1 = por %p5970_p0, %p5969_p12 }
  0x67   : > { %p5965_p9 = pneg %p5964_p7 }
  0x69   : > { %p5972_p4 = pnand %p5971_p1, %p5965_p9 }
  0x6b   : > { %5975 = shalt.err (!%p5972_p4)
}
  0x6c   : > { %5711 = dma.hbm_to_vmem [thread:$0]  (!%p6204_p11), %s7508_s4, 16, %s236_s15, [#allocation10]  }
  0x6d   : > { %s35_s24 = sadd.s32 1, %s6092_s22  ;;  %s44_s16 = sadd.s32 1, %s6084_s20 }
  0x6e   : > { %p37_p13 = scmp.ge.s32.totalorder %s35_s24, 2  ;;  %p51_p6 = scmp.ne.s32.totalorder %s6084_s20, %s6080_s19 }
  0x6f   : > { %p52_p2 = scmp.eq.s32.totalorder %s6096_s23, 0  ;;  %p5724_p8 = scmp.lt.s32.totalorder %s6096_s23, 2 }
  0x70   : > { %s7548_s24 = smov (%p37_p13, %s35_s24), 0  ;;  %p7528_p3 = scmp.ne.s32.totalorder %s7521_s27, 0 }
  0x71   : > { %p53_p10 = por %p52_p2, %p51_p6  ;;  %s39_s17 = ssub.s32 %s6092_s22, %s7548_s24 }
  0x72   : > { %p6317_p5 = por %p7528_p3, %p51_p6  ;;  %s246_s25 = sand.u32 1, %s6084_s20  }
  0x73   : > { %p42_p7 = scmp.eq.s32.totalorder %s39_s17, 0  ;;  %s5674_s15 = smul.u32 164, %s246_s25 }
  0x74   : > { %p6324_p11 = pnand %p5724_p8, %p53_p10  ;;  %s5675_s7 = smul.u32 2624, %s6092_s22 }
  0x75   : > { %s6329_s9 = scalar_select %p42_p7, %s6084_s20, %s44_s16  }
  0x76   : > { %s250_s10 = scalar_lea.vmem [#allocation3], %s5674_s15  ;;  %s6335_s29 = scalar_lea.hbm %s7504_s0, %s5675_s7 }
  0x77   : > { %s258_s12 = sshll.u32 %s250_s10, 4  ;;  %s6339_s14 = scalar_lea.sflag [#allocation4], %s246_s25  ;;  %s6337_s12 = int_to_ptr.vmem [resolvable:$true] %s258_s12 }
  0x78   : > { %s5976_s17 = scalar_lea.hbm %s6335_s29, 2624  ;;  %p5978_p12 = pneg %p6324_p11 }
  0x79   : > { %p5977_p9 = scmp.ne.s32.totalorder %s6335_s29, %s5976_s17  ;;  %s5981_s7 = scalar_lea.hbm %s7504_s0, 5248 }
  0x7a   : > { %p5982_p4 = scmp.lt.u32.totalorder %s6335_s29, %s7504_s0  ;;  %p5983_p13 = scmp.lt.u32.totalorder %s5981_s7, %s5976_s17 }
  0x7b   : > { %p5979_p0 = pnand %p5978_p12, %p5977_p9  ;;  %p5985_p2 = scmp.lt.u32.totalorder %s5976_s17, %s6335_s29 }
  0x7c   : > { %p5984_p6 = por %p5983_p13, %p5982_p4 }
  0x7d   : > { %p5980_p1 = pneg %p5979_p0 }
  0x7e   : > { %p5986_p8 = por %p5985_p2, %p5984_p6 }
  0x80   : > { %p5987_p10 = pnand %p5986_p8, %p5980_p1 }
  0x82   : > { %5990 = shalt.err (!%p5987_p10)
}
  0x83   : > { %s5991_s25 = scalar_lea.vmem %s6337_s12, 2624  ;;  %s6104_s18 = smov [#allocation3]  }
  0x84   : > { %p5992_p3 = scmp.ne.s32.totalorder %s6337_s12, %s5991_s25  ;;  %s5996_s16 = sshll.u32 %s6104_s18, 4  ;;  %s5997_s16 = int_to_ptr.vmem [resolvable:$false] %s5996_s16 }
  0x85   : > { %s5998_s15 = scalar_lea.vmem %s5997_s16, 5248  ;;  %p5999_p0 = scmp.lt.s32.totalorder %s6337_s12, %s5997_s16 }
  0x86   : > { %p5994_p7 = pnand %p5992_p3, %p5978_p12  ;;  %p6000_p4 = scmp.lt.s32.totalorder %s5998_s15, %s5991_s25 }
  0x88   : > { %p5995_p9 = pneg %p5994_p7  ;;  %p6001_p13 = por %p6000_p4, %p5999_p0 }
  0x8a   : > { %p6002_p6 = pnand %p6001_p13, %p5995_p9 }
  0x8c   : > { %6005 = shalt.err (!%p6002_p6)
}
  0x8d   : > { %5715 = dma.hbm_to_vmem [thread:$0]  (!%p6324_p11), %s6335_s29, 2624, %s6337_s12, %s6339_s14, %s6101_s11, %s6101_s11, %s6102_s13  }
  0x8e   : > { %p7531_p12 = scmp.ne.s32.totalorder %s7525_s30, 0 }
  0x90   : > { %270 = sbr.rel (%p7531_p12) target bundleno = 995 (0x3e3), region = 40 }
  0x97   : > { %s6373_s17 = sand.u32 1, %s6080_s19   ;;  %p7532_p1 = scmp.ne.s32.totalorder %s7522_s28, 0 }
  0x98   : > { %s5676_s7 = smul.u32 164, %s6373_s17  ;;  %s273_s10 = scalar_lea.sflag [#allocation4], %s6373_s17 }
  0x9a   : > { %s6377_s27 = scalar_lea.vmem [#allocation3], %s5676_s7 }
  0x9b   : > { %6059 = dma.done.wait (%p7532_p1), %s273_s10, 2624  }
  0x9c   : > { %6061 = vsyncadd (%p7532_p1), %s273_s10, 4294964672  ;;  %p7533_p11 = scmp.ne.s32.totalorder %s7520_s26, 0 }
  0x9e   : > { %6063 = dma.done.wait (%p7533_p11), [#allocation7], 592  }
  0x9f   : > { %6065 = vsyncadd (%p7533_p11), [#allocation7], 4294966704 }
  0xa0   : > { %6067 = dma.done.wait (%p7533_p11), [#allocation10], 144  }
  0xa1   : > { %6069 = vsyncadd (%p7533_p11), [#allocation10], 4294967152  ;;  %vm698_vm0 = vcmask 1043456   ;;  %vm494_vm1 = vsmask.f32 7424  ;;  %v6403_v7 = vld [vmem:[%s6377_s27 + $0x8] sm:$0xff]  }
  0xa2   : > { %v1850_v0 = vld [vmem:[#allocation6 + $0x10] sm:$0xf]  ;;  %v400_v1 = vld [vmem:[#allocation6 + $0x4] sm:$0xf]  ;;  %v361_v2 = vld [vmem:[%s6377_s27] sm:$0xf] }
  0xa3   : > { %5669 = vmatprep.subr.msk.bf16.mxu0 %vm698_vm0, %v1850_v0  ;;  %5665 = vmatprep.subr.msk.bf16.mxu1 %vm698_vm0, %v400_v1  ;;  %v2080_v3 = vsel %vm698_vm0, %v1850_v0, 0  ;;  %v700_v4 = vsel %vm698_vm0, %v400_v1, 0  ;;  %v6397_v5 = vld [vmem:[%s6377_s27 + $0x4] sm:$0xf]  ;;  %vm643_vm2 = vcmask 64512   ;;  %v503_v12 = vshll.u32 %v6403_v7, 16 }
  0xa4   : > { %5150 = vmatpush3.bf16.msra.mxu0 %v2080_v3  ;;  %4998 = vmatpush3.bf16.msra.mxu1 %v700_v4  ;;  %v6400_v6 = vcombine.low %v361_v2, %v6397_v5  ;;  %v1409_v8 = vld [vmem:[%s6377_s27 + $0x8] sm:$0xe]  ;;  %vm1854_vm3 = vsmask.f32 6400  ;;  %v6407_v9 = vld [vmem:[%s6377_s27 + $0xc] sm:$0xf] }
  0xa5   : > { %v507_v13 = vshrl.u32 %v6403_v7, 16  ;;  %v6414_v14 = vld [vmem:[%s6377_s27 + $0x10] sm:$0xff]   ;;  %v6420_v16 = vcombine.low %v1409_v8, %v6407_v9  ;;  %v2297_v17 = vld [vmem:[#allocation6 + $0x14] sm:$0xf]  ;;  %v505_v19 = vrot.slane %v503_v12, 1  ;;  %v6436_v35 = vld [vmem:[%s6377_s27 + $0x20] sm:$0xff]  }
  0xa6   : > { %v496_v10 = vshrl.u32 %v6400_v6, 16  ;;  %v498_v11 = vshll.u32 %v6400_v6, 16  ;;  %v6417_v15 = vld [vmem:[%s6377_s27 + $0x10] sm:$0xff]   ;;  %v1864_v20 = vshrl.u32 %v6414_v14, 16  ;;  %v1867_v21 = vshll.u32 %v6414_v14, 16  ;;  %5670 = vmatprep.subr.msk.bf16.mxu0 %vm698_vm0, %v2297_v17  ;;  %v6429_v25 = vld [vmem:[%s6377_s27 + $0x18] sm:$0xff]  }
  0xa7   : > { %7534 = vst [vmem:[#allocation19_spill] sm:$0xff] %v6420_v16  ;;  %v1856_v22 = vshrl.u32 %v6420_v16, 16  ;;  %v1859_v23 = vshll.u32 %v6420_v16, 16  ;;  %v511_v24 = vshll.u32 %v6417_v15, 16  ;;  %v509_v27 = vor.u32 %v507_v13, %v505_v19  ;;  %v6433_v34 = vld [vmem:[%s6377_s27 + $0x18] sm:$0xff]   ;;  %v6449_v48 = vld [vmem:[%s6377_s27 + $0x20] sm:$0xff]  }
  0xa8   : > { %v500_v18 = vrot.slane %v498_v11, 1  ;;  %v1866_v28 = vrot.slane %v1864_v20, 1  ;;  %v1869_v29 = vrot.slane %v1867_v21, 2  ;;  %v1873_v33 = vshrl.u32 %v6429_v25, 16  ;;  %v6452_v49 = vld [vmem:[%s6377_s27 + $0x28] sm:$0xff]   ;;  %v6461_v58 = vld [vmem:[%s6377_s27 + $0x30] sm:$0xff]  }
  0xa9   : > { %v1858_v30 = vrot.slane %v1856_v22, 1  ;;  %v1861_v31 = vrot.slane %v1859_v23, 2  ;;  %v513_v32 = vrot.slane %v511_v24, 1  ;;  %v1876_v38 = vshll.u32 %v6429_v25, 16  ;;  %v6457_v53 = vld [vmem:[%s6377_s27 + $0x28] sm:$0xff]   ;;  %v6482_v23 = vld [vmem:[%s6377_s27 + $0x38] sm:$0xff]  }
  0xaa   : > { %v501_v26 = vor.u32 %v500_v18, %v496_v10  ;;  %v1870_v37 = vor.u32 %v1869_v29, %v1866_v28  ;;  %v2394_v39 = vsel %vm698_vm0, %v2297_v17, 0  ;;  %v1875_v42 = vrot.slane %v1873_v33, 1  ;;  %v6476_v17 = vld [vmem:[%s6377_s27 + $0x30] sm:$0xff]   ;;  %v6487_v28 = vld [vmem:[%s6377_s27 + $0x38] sm:$0xff]   ;;  %v6493_v33 = vld [vmem:[%s6377_s27 + $0x40] sm:$0xff]   ;;  %s5677_s26 = smul.u32 288, %s6373_s17 }
  0xab   : > { %v1862_v40 = vor.u32 %v1861_v31, %v1858_v30  ;;  %v514_v41 = vsel %vm494_vm1, %v509_v27, %v513_v32  ;;  %v515_v43 = vshrl.u32 %v6417_v15, 16  ;;  %v1878_v44 = vrot.slane %v1876_v38, 2  ;;  %s5678_s30 = smul.u32 4608, %s6088_s21  ;;  %s4409_s21 = scalar_lea.sflag [#allocation5], %s6373_s17 }
  0xac   : > { %v506_v36 = vsel %vm494_vm1, %v501_v26, %v505_v19  ;;  %v519_v45 = vshll.u32 %v6433_v34, 16  ;;  %v1882_v46 = vshrl.u32 %v6436_v35, 16  ;;  %v1885_v47 = vshll.u32 %v6436_v35, 16  ;;  %s7376_s28 = scalar_lea.vmem [#allocation12], %s5677_s26  ;;  %s6106_s14 = smov [#allocation12]  }
  0xad   : > { %4999 = vmatprep.mubr.msk.bf16.mxu1 %vm643_vm2, %v506_v36  ;;  %v1871_v50 = vsel %vm1854_vm3, %v1862_v40, %v1870_v37  ;;  %v517_v51 = vor.u32 %v515_v43, %v513_v32  ;;  %v523_v52 = vshrl.u32 %v6433_v34, 16  ;;  %v1879_v54 = vor.u32 %v1878_v44, %v1875_v42  ;;  %v6499_v40 = vld [vmem:[%s6377_s27 + $0x40] sm:$0xff]   ;;  %s4422_s11 = sshll.u32 %s7376_s28, 4  ;;  %s7449_s12 = scalar_lea.hbm %s7509_s5, %s5678_s30  ;;  %s7451_s11 = int_to_ptr.vmem [resolvable:$true] %s4422_s11 }
  0xae   : > { %5000 = vmatmul.mubr.msk.bf16.vlgmr.msra.gmra.mrb[0].mxu1 %vm643_vm2, %v514_v41  ;;  %5151 = vmatprep.mubr.msk.bf16.mxu0 %vm643_vm2, %v1871_v50  ;;  %v521_v55 = vrot.slane %v519_v45, 1  ;;  %v1884_v56 = vrot.slane %v1882_v46, 1  ;;  %v1887_v57 = vrot.slane %v1885_v47, 2  ;;  %v527_v59 = vshll.u32 %v6449_v48, 16  ;;  %s6006_s29 = scalar_lea.vmem %s7451_s11, 4608  ;;  %s6010_s25 = sshll.u32 %s6106_s14, 4  ;;  %s6011_s25 = int_to_ptr.vmem [resolvable:$false] %s6010_s25 }
  0xaf   : > { %v1891_v60 = vshrl.u32 %v6452_v49, 16  ;;  %v1894_v61 = vshll.u32 %v6452_v49, 16  ;;  %v531_v62 = vshrl.u32 %v6449_v48, 16  ;;  %v1880_v63 = vsel %vm1854_vm3, %v1870_v37, %v1879_v54  ;;  %p6007_p2 = scmp.ne.s32.totalorder %s7451_s11, %s6006_s29  ;;  %s6012_s18 = scalar_lea.vmem %s6011_s25, 9216 }
  0xb0   : > { %v522_v0 = vsel %vm494_vm1, %v517_v51, %v521_v55  ;;  %v1888_v1 = vor.u32 %v1887_v57, %v1884_v56  ;;  %v525_v2 = vor.u32 %v523_v52, %v521_v55  ;;  %5152 = vmatmul.mubr.msk.bf16.vlgmr.msra.gmra.mrb[0].mxu0 %vm643_vm2, %v1880_v63  ;;  %v529_v3 = vrot.slane %v527_v59, 1  ;;  %v6507_v51 = vld [vmem:[%s6377_s27 + $0x48] sm:$0xff]   ;;  %p6013_p3 = scmp.lt.s32.totalorder %s7451_s11, %s6011_s25  ;;  %p6014_p7 = scmp.lt.s32.totalorder %s6012_s18, %s6006_s29 }
  0xb1   : > { %5003 = vmatprep.mubr.msk.bf16.mxu1 %vm643_vm2, %v522_v0  ;;  %v1893_v4 = vrot.slane %v1891_v60, 1  ;;  %v1896_v8 = vrot.slane %v1894_v61, 2  ;;  %v535_v10 = vshll.u32 %v6457_v53, 16  ;;  %5188 = vmatpush3.bf16.msra.mxu0 %v2394_v39  ;;  %v1900_v12 = vshrl.u32 %v6461_v58, 16  ;;  %p6008_p8 = pnand %p6007_p2, %p6317_p5 }
  0xb2   : > { %v1889_v11 = vsel %vm1854_vm3, %v1879_v54, %v1888_v1  ;;  %v1903_v13 = vshll.u32 %v6461_v58, 16  ;;  %v539_v18 = vshrl.u32 %v6457_v53, 16  ;;  %v530_v19 = vsel %vm494_vm1, %v525_v2, %v529_v3  ;;  %v6521_v2 = vld [vmem:[%s6377_s27 + $0x50] sm:$0xff]   ;;  %p6015_p9 = por %p6014_p7, %p6013_p3 }
  0xb3   : > { %5155 = vmatprep.mubr.msk.bf16.mxu0 %vm643_vm2, %v1889_v11  ;;  %v1897_v20 = vor.u32 %v1896_v8, %v1893_v4  ;;  %v533_v21 = vor.u32 %v531_v62, %v529_v3  ;;  %v537_v22 = vrot.slane %v535_v10, 1  ;;  %v1902_v24 = vrot.slane %v1900_v12, 1  ;;  %v6516_v62 = vld [vmem:[%s6377_s27 + $0x48] sm:$0xff]   ;;  %v6525_v8 = vld [vmem:[%s6377_s27 + $0x50] sm:$0xff]   ;;  %p6009_p10 = pneg %p6008_p8 }
  0xb4   : > { %v1905_v26 = vrot.slane %v1903_v13, 2  ;;  %v543_v27 = vshll.u32 %v6476_v17, 16  ;;  %v1909_v32 = vshrl.u32 %v6482_v23, 16  ;;  %v1912_v38 = vshll.u32 %v6482_v23, 16 }
  0xb5   : > { %v1898_v29 = vsel %vm1854_vm3, %v1888_v1, %v1897_v20  ;;  %v538_v30 = vsel %vm494_vm1, %v533_v21, %v537_v22  ;;  %v541_v31 = vor.u32 %v539_v18, %v537_v22  ;;  %v547_v39 = vshrl.u32 %v6476_v17, 16  ;;  %v6532_v18 = vld [vmem:[%s6377_s27 + $0x58] sm:$0xff]   ;;  %p6016_p0 = pnand %p6015_p9, %p6009_p10 }
  0xb6   : > { %5004 = vmatmul.mubr.msk.bf16.gmra.mrb[4].mxu1 %vm643_vm2, %v530_v19  ;;  %v1906_v36 = vor.u32 %v1905_v26, %v1902_v24  ;;  %v545_v37 = vrot.slane %v543_v27, 1  ;;  %v1911_v41 = vrot.slane %v1909_v32, 1  ;;  %v551_v42 = vshll.u32 %v6487_v28, 16  ;;  %v6536_v22 = vld [vmem:[%s6377_s27 + $0x58] sm:$0xff]   ;;  %v6542_v32 = vld [vmem:[%s6377_s27 + $0x60] sm:$0xff]  }
  0xb7   : > { %5007 = vmatprep.mubr.msk.bf16.mxu1 %vm643_vm2, %v538_v30  ;;  %v1918_v43 = vshrl.u32 %v6493_v33, 16  ;;  %v1921_v44 = vshll.u32 %v6493_v33, 16  ;;  %v1914_v47 = vrot.slane %v1912_v38, 2  ;;  %v555_v56 = vshrl.u32 %v6487_v28, 16 }
  0xb8   : > { %v1907_v45 = vsel %vm1854_vm3, %v1897_v20, %v1906_v36  ;;  %v546_v46 = vsel %vm494_vm1, %v541_v31, %v545_v37  ;;  %v549_v50 = vor.u32 %v547_v39, %v545_v37  ;;  %5156 = vmatmul.mubr.msk.bf16.gmra.mrb[4].mxu0 %vm643_vm2, %v1898_v29  ;;  %v553_v52 = vrot.slane %v551_v42, 1 }
  0xb9   : > { %v1920_v54 = vrot.slane %v1918_v43, 1  ;;  %v1923_v55 = vrot.slane %v1921_v44, 2  ;;  %5159 = vmatprep.mubr.msk.bf16.mxu0 %vm643_vm2, %v1907_v45  ;;  %v1915_v57 = vor.u32 %v1914_v47, %v1911_v41  ;;  %v559_v59 = vshll.u32 %v6499_v40, 16  ;;  %v6553_v44 = vld [vmem:[%s6377_s27 + $0x60] sm:$0xff]  }
  0xba   : > { %v1927_v60 = vshrl.u32 %v6507_v51, 16  ;;  %v1930_v61 = vshll.u32 %v6507_v51, 16  ;;  %v554_v63 = vsel %vm494_vm1, %v549_v50, %v553_v52  ;;  %v563_v1 = vshrl.u32 %v6499_v40, 16 }
  0xbb   : > { %v1924_v0 = vor.u32 %v1923_v55, %v1920_v54  ;;  %v561_v3 = vrot.slane %v559_v59, 1  ;;  %v557_v10 = vor.u32 %v555_v56, %v553_v52  ;;  %v567_v11 = vshll.u32 %v6516_v62, 16  ;;  %v6559_v52 = vld [vmem:[%s6377_s27 + $0x68] sm:$0xff]  }
  0xbc   : > { %v1929_v4 = vrot.slane %v1927_v60, 1  ;;  %v1936_v12 = vshrl.u32 %v6521_v2, 16  ;;  %v1939_v13 = vshll.u32 %v6521_v2, 16  ;;  %v1916_v19 = vsel %vm1854_vm3, %v1906_v36, %v1915_v57 }
  0xbd   : > { %v1932_v20 = vrot.slane %v1930_v61, 2  ;;  %v565_v21 = vor.u32 %v563_v1, %v561_v3  ;;  %v1925_v24 = vsel %vm1854_vm3, %v1915_v57, %v1924_v0  ;;  %v569_v26 = vrot.slane %v567_v11, 1 }
  0xbe   : > { %5008 = vmatmul.mubr.msk.bf16.gmra.mrb[8].mxu1 %vm643_vm2, %v546_v46  ;;  %v1938_v27 = vrot.slane %v1936_v12, 1  ;;  %v1941_v29 = vrot.slane %v1939_v13, 2  ;;  %v571_v30 = vshrl.u32 %v6516_v62, 16  ;;  %v575_v31 = vshll.u32 %v6525_v8, 16 }
  0xbf   : > { %5011 = vmatprep.mubr.msk.bf16.mxu1 %vm643_vm2, %v554_v63  ;;  %v562_v36 = vsel %vm494_vm1, %v557_v10, %v561_v3  ;;  %v1945_v37 = vshrl.u32 %v6532_v18, 16  ;;  %v1948_v38 = vshll.u32 %v6532_v18, 16  ;;  %v1933_v39 = vor.u32 %v1932_v20, %v1929_v4  ;;  %v6565_v63 = vld [vmem:[%s6377_s27 + $0x68] sm:$0xff]   ;;  %v6569_v10 = vld [vmem:[%s6377_s27 + $0x70] sm:$0xff]  }
  0xc0   : > { %5160 = vmatmul.mubr.msk.bf16.gmra.mrb[8].mxu0 %vm643_vm2, %v1916_v19  ;;  %v570_v41 = vsel %vm494_vm1, %v565_v21, %v569_v26  ;;  %v579_v42 = vshrl.u32 %v6525_v8, 16  ;;  %v583_v43 = vshll.u32 %v6536_v22, 16  ;;  %v1942_v45 = vor.u32 %v1941_v29, %v1938_v27  ;;  %v6581_v27 = vld [vmem:[%s6377_s27 + $0x70] sm:$0xff]  }
  0xc1   : > { %5163 = vmatprep.mubr.msk.bf16.mxu0 %vm643_vm2, %v1925_v24  ;;  %v1954_v46 = vshrl.u32 %v6542_v32, 16  ;;  %v1957_v47 = vshll.u32 %v6542_v32, 16  ;;  %v577_v50 = vrot.slane %v575_v31, 1  ;;  %v573_v54 = vor.u32 %v571_v30, %v569_v26 }
  0xc2   : > { %v1947_v55 = vrot.slane %v1945_v37, 1  ;;  %v1950_v56 = vrot.slane %v1948_v38, 2  ;;  %v585_v57 = vrot.slane %v583_v43, 1  ;;  %v1934_v59 = vsel %vm1854_vm3, %v1924_v0, %v1933_v39 }
  0xc3   : > { %v581_v60 = vor.u32 %v579_v42, %v577_v50  ;;  %v591_v61 = vshll.u32 %v6553_v44, 16  ;;  %v1943_v1 = vsel %vm1854_vm3, %v1933_v39, %v1942_v45  ;;  %v1956_v3 = vrot.slane %v1954_v46, 1  ;;  %v6588_v39 = vld [vmem:[%s6377_s27 + $0x78] sm:$0xff]  }
  0xc4   : > { %v1959_v4 = vrot.slane %v1957_v47, 2  ;;  %v587_v11 = vshrl.u32 %v6536_v22, 16  ;;  %v1963_v12 = vshrl.u32 %v6559_v52, 16  ;;  %v1966_v13 = vshll.u32 %v6559_v52, 16  ;;  %v6595_v47 = vld [vmem:[%s6377_s27 + $0x80] sm:$0xff]  }
  0xc5   : > { %v578_v0 = vsel %vm494_vm1, %v573_v54, %v577_v50  ;;  %v1951_v19 = vor.u32 %v1950_v56, %v1947_v55  ;;  %v586_v20 = vsel %vm494_vm1, %v581_v60, %v585_v57  ;;  %v593_v21 = vrot.slane %v591_v61, 1 }
  0xc6   : > { %5012 = vmatmul.mubr.msk.bf16.gmra.mrb[12].mxu1 %vm643_vm2, %v562_v36  ;;  %v595_v24 = vshrl.u32 %v6553_v44, 16  ;;  %v599_v26 = vshll.u32 %v6565_v63, 16  ;;  %v1960_v29 = vor.u32 %v1959_v4, %v1956_v3  ;;  %v1972_v30 = vshrl.u32 %v6569_v10, 16  ;;  %v6607_v4 = vld [vmem:[%s6377_s27 + $0x80] sm:$0xff]  }
  0xc7   : > { %5015 = vmatprep.mubr.msk.bf16.mxu1 %vm643_vm2, %v570_v41  ;;  %v1975_v31 = vshll.u32 %v6569_v10, 16  ;;  %v1965_v36 = vrot.slane %v1963_v12, 1  ;;  %v1968_v37 = vrot.slane %v1966_v13, 2  ;;  %v589_v38 = vor.u32 %v587_v11, %v585_v57  ;;  %v6591_v41 = vld [vmem:[%s6377_s27 + $0x78] sm:$0xff]   ;;  %7535 = vst [vmem:[#allocation20_spill] sm:$0xff] %v6607_v4 }
  0xc8   : > { %5164 = vmatmul.mubr.msk.bf16.gmra.mrb[12].mxu0 %vm643_vm2, %v1934_v59  ;;  %v1952_v42 = vsel %vm1854_vm3, %v1942_v45, %v1951_v19  ;;  %v597_v43 = vor.u32 %v595_v24, %v593_v21  ;;  %v601_v46 = vrot.slane %v599_v26, 1  ;;  %v1961_v50 = vsel %vm1854_vm3, %v1951_v19, %v1960_v29 }
  0xc9   : > { %5167 = vmatprep.mubr.msk.bf16.mxu0 %vm643_vm2, %v1943_v1  ;;  %v1974_v54 = vrot.slane %v1972_v30, 1  ;;  %v1977_v55 = vrot.slane %v1975_v31, 2  ;;  %v607_v56 = vshll.u32 %v6581_v27, 16  ;;  %v1969_v59 = vor.u32 %v1968_v37, %v1965_v36  ;;  %v6620_v36 = vld [vmem:[%s6377_s27 + $0x88] sm:$0xff]  }
  0xca   : > { %v603_v57 = vshrl.u32 %v6565_v63, 16  ;;  %v611_v60 = vshrl.u32 %v6581_v27, 16  ;;  %v594_v45 = vsel %vm494_vm1, %v589_v38, %v593_v21  ;;  %v1981_v61 = vshrl.u32 %v6588_v39, 16 }
  0xcb   : > { %v1984_v1 = vshll.u32 %v6588_v39, 16  ;;  %v615_v3 = vshll.u32 %v6591_v41, 16  ;;  %v602_v11 = vsel %vm494_vm1, %v597_v43, %v601_v46  ;;  %v1990_v12 = vshrl.u32 %v6595_v47, 16 }
  0xcc   : > { %v1993_v13 = vshll.u32 %v6595_v47, 16  ;;  %v609_v19 = vrot.slane %v607_v56, 1  ;;  %v1970_v21 = vsel %vm1854_vm3, %v1960_v29, %v1969_v59  ;;  %v605_v24 = vor.u32 %v603_v57, %v601_v46  ;;  %v6626_v56 = vld [vmem:[%s6377_s27 + $0x90] sm:$0xff]   ;;  %v6629_v29 = vld [vmem:[#allocation6 + $0x18] sm:$0xf] }
  0xcd   : > { %v1983_v26 = vrot.slane %v1981_v61, 1  ;;  %v1986_v30 = vrot.slane %v1984_v1, 2  ;;  %v617_v37 = vrot.slane %v615_v3, 1  ;;  %v1992_v38 = vrot.slane %v1990_v12, 1  ;;  %v6631_v46 = vld [vmem:[#allocation6 + $0x8] sm:$0xf]  ;;  %5671 = vmatprep.subr.msk.bf16.mxu0 %vm698_vm0, %v6629_v29 }
  0xce   : > { %5016 = vmatmul.mubr.msk.bf16.gmra.mrb[16].mxu1 %vm643_vm2, %v578_v0  ;;  %v1978_v0 = vor.u32 %v1977_v55, %v1974_v54  ;;  %v613_v31 = vor.u32 %v611_v60, %v609_v19  ;;  %v623_v43 = vshll.u32 %v6607_v4, 16  ;;  %v610_v60 = vsel %vm494_vm1, %v605_v24, %v609_v19 }
  0xcf   : > { %5019 = vmatprep.mubr.msk.bf16.mxu1 %vm643_vm2, %v586_v20  ;;  %v6614_v20 = vld [vmem:[%s6377_s27 + $0x88] sm:$0xff]   ;;  %v631_v61 = vshll.u32 %v6620_v36, 16  ;;  %v1987_v1 = vor.u32 %v1986_v30, %v1983_v26  ;;  %v627_v12 = vshrl.u32 %v6607_v4, 16  ;;  %v2011_v24 = vshll.u32 %v6626_v56, 16 }
  0xd0   : > { %5168 = vmatmul.mubr.msk.bf16.gmra.mrb[16].mxu0 %vm643_vm2, %v1952_v42  ;;  %v1995_v42 = vrot.slane %v1993_v13, 2  ;;  %v1979_v54 = vsel %vm1854_vm3, %v1969_v59, %v1978_v0  ;;  %v1999_v55 = vshrl.u32 %v6614_v20, 16  ;;  %v619_v59 = vshrl.u32 %v6591_v41, 16 }
  0xd1   : > { %5171 = vmatprep.mubr.msk.bf16.mxu0 %vm643_vm2, %v1961_v50  ;;  %v397_v50 = vld [vmem:[#allocation6] sm:$0xf]  ;;  %v618_v3 = vsel %vm494_vm1, %v613_v31, %v617_v37  ;;  %v625_v13 = vrot.slane %v623_v43, 1  ;;  %v633_v31 = vrot.slane %v631_v61, 1  ;;  %v635_v16 = vshrl.u32 %v6620_v36, 16 }
  0xd2   : > { %5666 = vmatprep.subr.msk.bf16.mxu1 %vm698_vm0, %v397_v50  ;;  %v916_v57 = vsel %vm698_vm0, %v397_v50, 0  ;;  %v2001_v19 = vrot.slane %v1999_v55, 1  ;;  %v6650_v50 = vld [vmem:[%s6377_s27 + $0x90] ss:$0 sps:$4 sm:$0x11]   ;;  %v621_v26 = vor.u32 %v619_v59, %v617_v37  ;;  %vm2301_vm4 = vcmask 1045504  }
  0xd3   : > { %5036 = vmatpush3.bf16.msra.mxu1 %v916_v57  ;;  %v2013_v57 = vrot.slane %v2011_v24, 2  ;;  %v2335_v61 = vrot.slane %v6626_v56, 2  ;;  %vm1101_vm5 = vcmask 1046528   ;;  %vm3054_vm6 = vsmask.f32 5376 }
  0xd4   : > { %5667 = vmatprep.subr.msk.bf16.mxu1 %vm698_vm0, %v6631_v46  ;;  %v626_v4 = vsel %vm494_vm1, %v621_v26, %v625_v13  ;;  %vm3501_vm7 = vcmask 1044480   ;;  %vm324_vm8 = vcmask 130048  }
  0xd6   : > { %5020 = vmatmul.mubr.msk.bf16.gmra.mrb[20].mxu1 %vm643_vm2, %v594_v45  ;;  %v2002_v45 = vshll.u32 %v6614_v20, 16 }
  0xd7   : > { %5023 = vmatprep.mubr.msk.bf16.mxu1 %vm643_vm2, %v602_v11  ;;  %v1996_v11 = vor.u32 %v1995_v42, %v1992_v38  ;;  %v1988_v38 = vsel %vm1854_vm3, %v1978_v0, %v1987_v1  ;;  %v629_v42 = vor.u32 %v627_v12, %v625_v13  ;;  %v2295_v12 = vld [vmem:[%s6377_s27 + $0x8] sm:$0xc] }
  0xd8   : > { %5172 = vmatmul.mubr.msk.bf16.gmra.mrb[20].mxu0 %vm643_vm2, %v1970_v21  ;;  %v2008_v21 = vshrl.u32 %v6626_v56, 16  ;;  %v2004_v30 = vrot.slane %v2002_v45, 2 }
  0xd9   : > { %5175 = vmatprep.mubr.msk.bf16.mxu0 %vm643_vm2, %v1979_v54  ;;  %v5824_v54 = vld [vmem:[%s6377_s27 + $0x98] ss:$0 sps:$4 sm:$0x33]   ;;  %v1997_v43 = vsel %vm1854_vm3, %v1987_v1, %v1996_v11  ;;  %v634_v0 = vsel %vm494_vm1, %v629_v42, %v633_v31  ;;  %v2303_v42 = vrot.slane %v6414_v14, 2  ;;  %v2307_v14 = vrot.slane %v6436_v35, 2 }
  0xda   : > { %v2010_v55 = vrot.slane %v2008_v21, 1  ;;  %v2020_v37 = vshll.u32 %v5824_v54, 16  ;;  %v2005_v59 = vor.u32 %v2004_v30, %v2001_v19  ;;  %v2337_v1 = vrot.slane %v5824_v54, 2 }
  0xdb   : > { %v637_v21 = vor.u32 %v635_v16, %v633_v31  ;;  %v2309_v35 = vrot.slane %v6452_v49, 2  ;;  %v2313_v49 = vrot.slane %v6482_v23, 2  ;;  %v2317_v23 = vrot.slane %v6507_v51, 2 }
  0xdc   : > { %v2014_v45 = vor.u32 %v2013_v57, %v2010_v55  ;;  %v6669_v13 = vsel %vm2301_vm4, %v2335_v61, %v2337_v1  ;;  %v2006_v19 = vsel %vm1854_vm3, %v1996_v11, %v2005_v59  ;;  %v2022_v30 = vrot.slane %v2020_v37, 2  ;;  %v6712_v37 = vld [vmem:[#allocation6 + $0xc] sm:$0xf] }
  0xdd   : > { %v1194_v55 = vsel %vm698_vm0, %v6631_v46, 0  ;;  %v2833_v57 = vsel %vm698_vm0, %v6629_v29, 0  ;;  %v2311_v46 = vrot.slane %v6461_v58, 2  ;;  %v2310_v29 = vsel %vm2301_vm4, %v2307_v14, %v2309_v35 }
  0xde   : > { %5024 = vmatmul.mubr.msk.bf16.gmra.mrb[24].mxu1 %vm643_vm2, %v610_v60  ;;  %v639_v60 = vshll.u32 %v6650_v50, 16  ;;  %v2315_v58 = vrot.slane %v6493_v33, 2  ;;  %v2323_v51 = vrot.slane %v6542_v32, 2 }
  0xdf   : > { %5027 = vmatprep.mubr.msk.bf16.mxu1 %vm643_vm2, %v618_v3  ;;  %v2017_v3 = vshrl.u32 %v5824_v54, 16  ;;  %v4689_v54 = vcombine.low %v2295_v12, %v6407_v9  ;;  %v2305_v9 = vrot.slane %v6429_v25, 2  ;;  %v6697_v25 = vld [vmem:[#allocation6 + $0x1c] sm:$0xf]  ;;  %v2321_v12 = vrot.slane %v6532_v18, 2 }
  0xe0   : > { %5176 = vmatmul.mubr.msk.bf16.gmra.mrb[24].mxu0 %vm643_vm2, %v1988_v38  ;;  %v641_v24 = vrot.slane %v639_v60, 1  ;;  %v2015_v38 = vsel %vm1854_vm3, %v2005_v59, %v2014_v45  ;;  %v2314_v59 = vsel %vm2301_vm4, %v2311_v46, %v2313_v49  ;;  %v2318_v33 = vsel %vm2301_vm4, %v2315_v58, %v2317_v23 }
  0xe1   : > { %5179 = vmatprep.mubr.msk.bf16.mxu0 %vm643_vm2, %v1997_v43  ;;  %v2019_v26 = vrot.slane %v2017_v3, 1  ;;  %v2302_v31 = vrot.slane %v4689_v54, 2  ;;  %v2308_v60 = vsel %vm2301_vm4, %v2305_v9, %v2307_v14  ;;  %v2312_v3 = vsel %vm2301_vm4, %v2309_v35, %v2311_v46  ;;  %v6804_v46 = vld [vmem:[%s6377_s27 + $0x28] sm:$0xff]  }
  0xe2   : > { %v2327_v18 = vrot.slane %v6569_v10, 2  ;;  %v2331_v10 = vrot.slane %v6595_v47, 2 }
  0xe3   : > { %v2023_v16 = vor.u32 %v2022_v30, %v2019_v26  ;;  %v2304_v43 = vsel %vm2301_vm4, %v2302_v31, %v2303_v42  ;;  %v7536_v31 = vld [vmem:[#allocation20_spill] sm:$0xff] }
  0xe5   : > { %v2024_v11 = vsel %vm1854_vm3, %v2014_v45, %v2023_v16  ;;  %v2319_v45 = vrot.slane %v6521_v2, 2  ;;  %v6774_v16 = vld [vmem:[%s6377_s27 + $0x14] sm:$0xf] }
  0xe6   : > { %5028 = vmatmul.mubr.msk.bf16.gmra.mrb[28].mxu1 %vm643_vm2, %v626_v4  ;;  %v642_v4 = vsel %vm494_vm1, %v637_v21, %v641_v24  ;;  %v2324_v21 = vsel %vm2301_vm4, %v2321_v12, %v2323_v51  ;;  %v2325_v24 = vrot.slane %v6559_v52, 2  ;;  %v2329_v52 = vrot.slane %v6588_v39, 2 }
  0xe7   : > { %5031 = vmatprep.mubr.msk.bf16.mxu1 %vm643_vm2, %v634_v0  ;;  %v2316_v0 = vsel %vm2301_vm4, %v2313_v49, %v2315_v58  ;;  %v2320_v1 = vsel %vm2301_vm4, %v2317_v23, %v2319_v45  ;;  %v2322_v2 = vsel %vm2301_vm4, %v2319_v45, %v2321_v12  ;;  %v2333_v39 = vrot.slane %v6614_v20, 2  ;;  %v6827_v45 = vld [vmem:[%s6377_s27 + $0x38] sm:$0xff]  }
  0xe8   : > { %5180 = vmatmul.mubr.msk.bf16.gmra.mrb[28].mxu0 %vm643_vm2, %v2006_v19  ;;  %v2326_v32 = vsel %vm2301_vm4, %v2323_v51, %v2325_v24  ;;  %v2328_v19 = vsel %vm2301_vm4, %v2325_v24, %v2327_v18  ;;  %v2330_v26 = vsel %vm2301_vm4, %v2327_v18, %v2329_v52  ;;  %v2332_v30 = vsel %vm2301_vm4, %v2329_v52, %v2331_v10  ;;  %v6849_v18 = vld [vmem:[%s6377_s27 + $0x48] sm:$0xff]  }
  0xe9   : > { %5183 = vmatprep.mubr.msk.bf16.mxu0 %vm643_vm2, %v2015_v38  ;;  %v1095_v38 = vld [vmem:[%s6377_s27] sm:$0xe]  ;;  %v1633_v49 = vsel %vm698_vm0, %v6712_v37, 0  ;;  %v3280_v23 = vsel %vm698_vm0, %v6697_v25, 0  ;;  %v1113_v12 = vrot.slane %v6476_v17, 1  ;;  %v2754_v52 = vrot.slane %v6849_v18, 2 }
  0xea   : > { %v4614_v54 = vcombine.low %v1095_v38, %v6397_v5  ;;  %v2336_v5 = vsel %vm2301_vm4, %v2333_v39, %v2335_v61  ;;  %v1105_v61 = vrot.slane %v6417_v15, 1 }
  0xee   : > { %5032 = vmatmul.mubr.msk.bf16.gmra.mrb[32].mxu1 %vm643_vm2, %v642_v4  ;;  %v2609_v4 = vld [vmem:[%s6377_s27 + $0x10] sm:$0xc] }
  0xef   : > { %5037 = vmatprep.mubr.msk.bf16.mxu1 %vm643_vm2, %v6400_v6  ;;  %v2306_v6 = vsel %vm2301_vm4, %v2303_v42, %v2305_v9  ;;  %v2334_v42 = vsel %vm2301_vm4, %v2331_v10, %v2333_v39  ;;  %v6784_v9 = vcombine.low %v2609_v4, %v6774_v16  ;;  %v6867_v39 = vld [vmem:[%s6377_s27 + $0x58] sm:$0xff]  }
  0xf0   : > { %5184 = vmatmul.mubr.msk.bf16.gmra.mrb[32].mxu0 %vm643_vm2, %v2024_v11  ;;  %v1102_v11 = vrot.slane %v4614_v54, 1 }
  0xf1   : > { %5189 = vmatprep.mubr.msk.bf16.mxu0 %vm643_vm2, %v2304_v43  ;;  %v1103_v43 = vrot.slane %v6403_v7, 1 }
  0xf3   : > { %v1104_v14 = vsel %vm1101_vm5, %v1102_v11, %v1103_v43 }
  0xf6   : > { %5038 = vmatmul.mubr.msk.bf16.vlgmr.msra.gmra.mrb[0].mxu1 %vm643_vm2, %v6403_v7 }
  0xf7   : > { %5041 = vmatprep.mubr.msk.bf16.mxu1 %vm643_vm2, %v6417_v15  ;;  %5074 = vmatpush3.bf16.msra.mxu1 %v1194_v55  ;;  %v6787_v55 = vld [vmem:[%s6377_s27 + $0x18] sm:$0xff]  }
  0xf8   : > { %5190 = vmatmul.mubr.msk.bf16.vlgmr.msra.gmra.mrb[0].mxu0 %vm643_vm2, %v2306_v6  ;;  %5668 = vmatprep.subr.msk.bf16.mxu1 %vm698_vm0, %v6712_v37  ;;  %v2741_v6 = vrot.slane %v6784_v9, 2  ;;  %v2742_v7 = vrot.slane %v6787_v55, 2 }
  0xf9   : > { %5226 = vmatpush3.bf16.msra.mxu0 %v2833_v57  ;;  %5193 = vmatprep.mubr.msk.bf16.mxu0 %vm643_vm2, %v2308_v60  ;;  %v6799_v57 = vld [vmem:[%s6377_s27 + $0x20] sm:$0xff]   ;;  %v1107_v60 = vrot.slane %v6433_v34, 1 }
  0xfa   : > { %5672 = vmatprep.subr.msk.bf16.mxu0 %vm698_vm0, %v6697_v25  ;;  %v2743_v35 = vsel %vm2301_vm4, %v2741_v6, %v2742_v7  ;;  %v2750_v25 = vrot.slane %v6827_v45, 2  ;;  %v6885_v6 = vld [vmem:[%s6377_s27 + $0x68] sm:$0xff]  }
  0xfb   : > { %v1108_v15 = vsel %vm1101_vm5, %v1105_v61, %v1107_v60 }
  0xfe   : > { %5042 = vmatmul.mubr.msk.bf16.gmra.mrb[4].mxu1 %vm643_vm2, %v6433_v34  ;;  %v2746_v34 = vrot.slane %v6804_v46, 2 }
  0xff   : > { %5045 = vmatprep.mubr.msk.bf16.mxu1 %vm643_vm2, %v6449_v48 }
 0x100   : > { %5194 = vmatmul.mubr.msk.bf16.gmra.mrb[4].mxu0 %vm643_vm2, %v2310_v29  ;;  %v1106_v29 = vsel %vm1101_vm5, %v1103_v43, %v1105_v61  ;;  %v6880_v43 = vld [vmem:[%s6377_s27 + $0x60] sm:$0xff]  }
 0x101   : > { %5197 = vmatprep.mubr.msk.bf16.mxu0 %vm643_vm2, %v2312_v3  ;;  %v2744_v3 = vrot.slane %v6799_v57, 2 }
 0x103   : > { %v2745_v58 = vsel %vm2301_vm4, %v2742_v7, %v2744_v3  ;;  %v2747_v37 = vsel %vm2301_vm4, %v2744_v3, %v2746_v34  ;;  %v1127_v3 = vrot.slane %v6565_v63, 1 }
 0x106   : > { %5046 = vmatmul.mubr.msk.bf16.gmra.mrb[8].mxu1 %vm643_vm2, %v6457_v53 }
 0x107   : > { %5049 = vmatprep.mubr.msk.bf16.mxu1 %vm643_vm2, %v6476_v17 }
 0x108   : > { %5198 = vmatmul.mubr.msk.bf16.gmra.mrb[8].mxu0 %vm643_vm2, %v2314_v59  ;;  %v6820_v59 = vld [vmem:[%s6377_s27 + $0x30] sm:$0xff]  }
 0x109   : > { %5201 = vmatprep.mubr.msk.bf16.mxu0 %vm643_vm2, %v2316_v0  ;;  %v1111_v0 = vrot.slane %v6457_v53, 1  ;;  %v2748_v53 = vrot.slane %v6820_v59, 2 }
 0x10b   : > { %v2749_v51 = vsel %vm2301_vm4, %v2746_v34, %v2748_v53  ;;  %v2751_v24 = vsel %vm2301_vm4, %v2748_v53, %v2750_v25  ;;  %v6921_v53 = vld [vmem:[%s6377_s27 + $0x88] sm:$0xff]  }
 0x10e   : > { %5050 = vmatmul.mubr.msk.bf16.gmra.mrb[12].mxu1 %vm643_vm2, %v6487_v28 }
 0x10f   : > { %5053 = vmatprep.mubr.msk.bf16.mxu1 %vm643_vm2, %v6499_v40 }
 0x110   : > { %5202 = vmatmul.mubr.msk.bf16.gmra.mrb[12].mxu0 %vm643_vm2, %v2318_v33  ;;  %v6829_v33 = vld [vmem:[#allocation6 + $0x20] sm:$0xf] }
 0x111   : > { %5205 = vmatprep.mubr.msk.bf16.mxu0 %vm643_vm2, %v2320_v1 }
 0x116   : > { %5054 = vmatmul.mubr.msk.bf16.gmra.mrb[16].mxu1 %vm643_vm2, %v6516_v62 }
 0x117   : > { %5057 = vmatprep.mubr.msk.bf16.mxu1 %vm643_vm2, %v6525_v8 }
 0x118   : > { %5206 = vmatmul.mubr.msk.bf16.gmra.mrb[16].mxu0 %vm643_vm2, %v2322_v2  ;;  %v6844_v2 = vld [vmem:[%s6377_s27 + $0x40] sm:$0xff]  }
 0x119   : > { %5209 = vmatprep.mubr.msk.bf16.mxu0 %vm643_vm2, %v2324_v21  ;;  %v1115_v21 = vrot.slane %v6487_v28, 1  ;;  %v2752_v17 = vrot.slane %v6844_v2, 2  ;;  %v1117_v28 = vrot.slane %v6499_v40, 1 }
 0x11b   : > { %v2753_v10 = vsel %vm2301_vm4, %v2750_v25, %v2752_v17  ;;  %v2755_v38 = vsel %vm2301_vm4, %v2752_v17, %v2754_v52  ;;  %v1118_v54 = vsel %vm1101_vm5, %v1115_v21, %v1117_v28 }
 0x11e   : > { %5058 = vmatmul.mubr.msk.bf16.gmra.mrb[20].mxu1 %vm643_vm2, %v6536_v22 }
 0x11f   : > { %5061 = vmatprep.mubr.msk.bf16.mxu1 %vm643_vm2, %v6553_v44 }
 0x120   : > { %5210 = vmatmul.mubr.msk.bf16.gmra.mrb[20].mxu0 %vm643_vm2, %v2326_v32  ;;  %v1114_v32 = vsel %vm1101_vm5, %v1111_v0, %v1113_v12 }
 0x121   : > { %5213 = vmatprep.mubr.msk.bf16.mxu0 %vm643_vm2, %v2328_v19  ;;  %v1116_v19 = vsel %vm1101_vm5, %v1113_v12, %v1115_v21  ;;  %v2770_v12 = vrot.slane %v6921_v53, 2  ;;  %v6934_v21 = vld [vmem:[%s6377_s27 + $0x90] sm:$0xff]  }
 0x126   : > { %5062 = vmatmul.mubr.msk.bf16.gmra.mrb[24].mxu1 %vm643_vm2, %v6565_v63  ;;  %v1129_v63 = vrot.slane %v6581_v27, 1 }
 0x127   : > { %5065 = vmatprep.mubr.msk.bf16.mxu1 %vm643_vm2, %v6581_v27 }
 0x128   : > { %5214 = vmatmul.mubr.msk.bf16.gmra.mrb[24].mxu0 %vm643_vm2, %v2330_v26  ;;  %v6862_v26 = vld [vmem:[%s6377_s27 + $0x50] sm:$0xff]  }
 0x129   : > { %5217 = vmatprep.mubr.msk.bf16.mxu0 %vm643_vm2, %v2332_v30  ;;  %v1119_v30 = vrot.slane %v6516_v62, 1  ;;  %v2756_v40 = vrot.slane %v6862_v26, 2  ;;  %v1121_v62 = vrot.slane %v6525_v8, 1  ;;  %v2760_v8 = vrot.slane %v6880_v43, 2 }
 0x12b   : > { %v1120_v4 = vsel %vm1101_vm5, %v1117_v28, %v1119_v30  ;;  %v2757_v11 = vsel %vm2301_vm4, %v2754_v52, %v2756_v40  ;;  %v1122_v7 = vsel %vm1101_vm5, %v1119_v30, %v1121_v62  ;;  %v3064_v30 = vshrl.u32 %v6787_v55, 16 }
 0x12e   : > { %5066 = vmatmul.mubr.msk.bf16.gmra.mrb[28].mxu1 %vm643_vm2, %v6591_v41 }
 0x12f   : > { %5069 = vmatprep.mubr.msk.bf16.mxu1 %vm643_vm2, %v7536_v31 }
 0x130   : > { %5218 = vmatmul.mubr.msk.bf16.gmra.mrb[28].mxu0 %vm643_vm2, %v2334_v42  ;;  %v2758_v42 = vrot.slane %v6867_v39, 2 }
 0x131   : > { %5221 = vmatprep.mubr.msk.bf16.mxu0 %vm643_vm2, %v2336_v5  ;;  %v1123_v5 = vrot.slane %v6536_v22, 1  ;;  %v1125_v22 = vrot.slane %v6553_v44, 1 }
 0x133   : > { %v1124_v61 = vsel %vm1101_vm5, %v1121_v62, %v1123_v5  ;;  %v1126_v34 = vsel %vm1101_vm5, %v1123_v5, %v1125_v22  ;;  %v7537_v62 = vld [vmem:[#allocation19_spill] sm:$0xff] }
 0x134   : > { %v5850_v5 = vld [vmem:[%s6377_s27 + $0x10] sm:$0xff]  }
 0x136   : > { %5070 = vmatmul.mubr.msk.bf16.gmra.mrb[32].mxu1 %vm643_vm2, %v6620_v36 }
 0x137   : > { %5075 = vmatprep.mubr.msk.bf16.mxu1 %vm643_vm2, %v1104_v14  ;;  %v2759_v14 = vsel %vm2301_vm4, %v2756_v40, %v2758_v42 }
 0x138   : > { %5222 = vmatmul.mubr.msk.bf16.gmra.mrb[32].mxu0 %vm643_vm2, %v6669_v13  ;;  %v1109_v13 = vrot.slane %v6449_v48, 1 }
 0x139   : > { %5227 = vmatprep.mubr.msk.bf16.mxu0 %vm643_vm2, %v2743_v35  ;;  %v2761_v35 = vsel %vm2301_vm4, %v2758_v42, %v2760_v8  ;;  %v5845_v42 = vld [vmem:[%s6377_s27 + $0xa0] ss:$0 sps:$4 sm:$0x33]  }
 0x13a   : > { %v1110_v48 = vsel %vm1101_vm5, %v1107_v60, %v1109_v13  ;;  %v1112_v1 = vsel %vm1101_vm5, %v1109_v13, %v1111_v0  ;;  %v2762_v60 = vrot.slane %v6885_v6, 2  ;;  %v1128_v13 = vsel %vm1101_vm5, %v1125_v22, %v1127_v3 }
 0x13e   : > { %5076 = vmatmul.mubr.msk.bf16.vlgmr.msra.gmra.mrb[0].mxu1 %vm643_vm2, %v1106_v29  ;;  %v6898_v29 = vld [vmem:[%s6377_s27 + $0x70] sm:$0xff]  }
 0x13f   : > { %5079 = vmatprep.mubr.msk.bf16.mxu1 %vm643_vm2, %v1108_v15  ;;  %5112 = vmatpush3.bf16.msra.mxu1 %v1633_v49  ;;  %v2763_v15 = vsel %vm2301_vm4, %v2760_v8, %v2762_v60  ;;  %v6903_v49 = vld [vmem:[%s6377_s27 + $0x78] sm:$0xff]   ;;  %v2764_v44 = vrot.slane %v6898_v29, 2  ;;  %v3066_v8 = vrot.slane %v3064_v30, 2 }
 0x140   : > { %5228 = vmatmul.mubr.msk.bf16.vlgmr.msra.gmra.mrb[0].mxu0 %vm643_vm2, %v2745_v58  ;;  %v2766_v58 = vrot.slane %v6903_v49, 2 }
 0x141   : > { %5264 = vmatpush3.bf16.msra.mxu0 %v3280_v23  ;;  %5231 = vmatprep.mubr.msk.bf16.mxu0 %vm643_vm2, %v2747_v37  ;;  %v2765_v0 = vsel %vm2301_vm4, %v2762_v60, %v2764_v44  ;;  %v6916_v23 = vld [vmem:[%s6377_s27 + $0x80] sm:$0xff]   ;;  %v1131_v37 = vrot.slane %v6591_v41, 1  ;;  %v1133_v41 = vrot.slane %v7536_v31, 1  ;;  %v2772_v31 = vrot.slane %v6934_v21, 2 }
 0x142   : > { %5673 = vmatprep.subr.msk.bf16.mxu0 %vm698_vm0, %v6829_v33  ;;  %v2768_v27 = vrot.slane %v6916_v23, 2 }
 0x143   : > { %v1132_v25 = vsel %vm1101_vm5, %v1129_v63, %v1131_v37  ;;  %v2773_v40 = vsel %vm2301_vm4, %v2770_v12, %v2772_v31 }
 0x144   : > { %v2771_v17 = vsel %vm2301_vm4, %v2768_v27, %v2770_v12 }
 0x146   : > { %5080 = vmatmul.mubr.msk.bf16.gmra.mrb[4].mxu1 %vm643_vm2, %v1110_v48  ;;  %v2767_v48 = vsel %vm2301_vm4, %v2764_v44, %v2766_v58  ;;  %v3082_v44 = vshrl.u32 %v6804_v46, 16 }
 0x147   : > { %5083 = vmatprep.mubr.msk.bf16.mxu1 %vm643_vm2, %v1112_v1  ;;  %v1130_v1 = vsel %vm1101_vm5, %v1127_v3, %v1129_v63  ;;  %v3076_v3 = vshll.u32 %v6799_v57, 16 }
 0x148   : > { %5232 = vmatmul.mubr.msk.bf16.gmra.mrb[4].mxu0 %vm643_vm2, %v2749_v51  ;;  %v2769_v51 = vsel %vm2301_vm4, %v2766_v58, %v2768_v27  ;;  %v5851_v58 = vld [vmem:[%s6377_s27 + $0x18] sm:$0xff]   ;;  %v3084_v12 = vrot.slane %v3082_v44, 2 }
 0x149   : > { %5235 = vmatprep.mubr.msk.bf16.mxu0 %vm643_vm2, %v2751_v24  ;;  %v1135_v24 = vrot.slane %v6620_v36, 1  ;;  %v3056_v36 = vshrl.u32 %v6784_v9, 16  ;;  %v1544_v63 = vrot.slane %v5851_v58, 1 }
 0x14b   : > { %v1136_v52 = vsel %vm1101_vm5, %v1133_v41, %v1135_v24 }
 0x14e   : > { %5084 = vmatmul.mubr.msk.bf16.gmra.mrb[8].mxu1 %vm643_vm2, %v1114_v32  ;;  %v6938_v32 = vld [vmem:[%s6377_s27 + $0x98] sm:$0xff]  }
 0x14f   : > { %5087 = vmatprep.mubr.msk.bf16.mxu1 %vm643_vm2, %v1116_v19  ;;  %v1134_v19 = vsel %vm1101_vm5, %v1131_v37, %v1133_v41  ;;  %v2774_v28 = vrot.slane %v6938_v32, 2 }
 0x150   : > { %5236 = vmatmul.mubr.msk.bf16.gmra.mrb[8].mxu0 %vm643_vm2, %v2753_v10  ;;  %v3059_v10 = vshll.u32 %v6784_v9, 16  ;;  %v3058_v9 = vrot.slane %v3056_v36, 2  ;;  %v3103_v36 = vshll.u32 %v6827_v45, 16 }
 0x151   : > { %5239 = vmatprep.mubr.msk.bf16.mxu0 %vm643_vm2, %v2755_v38  ;;  %v3067_v38 = vshll.u32 %v6787_v55, 16 }
 0x156   : > { %5088 = vmatmul.mubr.msk.bf16.gmra.mrb[12].mxu1 %vm643_vm2, %v1118_v54  ;;  %v1137_v54 = vrot.slane %v6650_v50, 1  ;;  %v2776_v50 = vrot.slane %v5845_v42, 2 }
 0x157   : > { %5091 = vmatprep.mubr.msk.bf16.mxu1 %vm643_vm2, %v1120_v4  ;;  %v2775_v4 = vsel %vm2301_vm4, %v2772_v31, %v2774_v28  ;;  %v3094_v31 = vshll.u32 %v6820_v59, 16 }
 0x158   : > { %5240 = vmatmul.mubr.msk.bf16.gmra.mrb[12].mxu0 %vm643_vm2, %v2757_v11  ;;  %v1541_v11 = vrot.slane %v7537_v62, 1  ;;  %v1138_v60 = vsel %vm1101_vm5, %v1135_v24, %v1137_v54  ;;  %v3594_v62 = vsel %vm698_vm0, %v6829_v33, 0  ;;  %v3112_v33 = vshll.u32 %v6844_v2, 16 }
 0x159   : > { %5243 = vmatprep.mubr.msk.bf16.mxu0 %vm643_vm2, %v2759_v14  ;;  %v1542_v14 = vrot.slane %v5850_v5, 1 }
 0x15a   : > { %v3114_v44 = vrot.slane %v3112_v33, 3 }
 0x15b   : > { %v1543_v22 = vsel %vm1101_vm5, %v1541_v11, %v1542_v14 }
 0x15e   : > { %5092 = vmatmul.mubr.msk.bf16.gmra.mrb[16].mxu1 %vm643_vm2, %v1122_v7  ;;  %v3061_v7 = vrot.slane %v3059_v10, 3  ;;  %v5853_v10 = vld [vmem:[%s6377_s27 + $0x28] sm:$0xff]  }
 0x15f   : > { %5095 = vmatprep.mubr.msk.bf16.mxu1 %vm643_vm2, %v1124_v61  ;;  %v3069_v61 = vrot.slane %v3067_v38, 3  ;;  %v1548_v30 = vrot.slane %v5853_v10, 1 }
 0x160   : > { %5244 = vmatmul.mubr.msk.bf16.gmra.mrb[16].mxu0 %vm643_vm2, %v2761_v35  ;;  %v3073_v35 = vshrl.u32 %v6799_v57, 16 }
 0x161   : > { %5247 = vmatprep.mubr.msk.bf16.mxu0 %vm643_vm2, %v2763_v15  ;;  %v3062_v15 = vor.u32 %v3061_v7, %v3058_v9 }
 0x162   : > { %v3075_v37 = vrot.slane %v3073_v35, 2  ;;  %v5855_v35 = vld [vmem:[%s6377_s27 + $0x38] sm:$0xff]  }
 0x166   : > { %5096 = vmatmul.mubr.msk.bf16.gmra.mrb[20].mxu1 %vm643_vm2, %v1126_v34  ;;  %v3070_v34 = vor.u32 %v3069_v61, %v3066_v8  ;;  %v3109_v61 = vshrl.u32 %v6844_v2, 16 }
 0x167   : > { %5099 = vmatprep.mubr.msk.bf16.mxu1 %vm643_vm2, %v1128_v13  ;;  %v3085_v13 = vshll.u32 %v6804_v46, 16 }
 0x168   : > { %5248 = vmatmul.mubr.msk.bf16.gmra.mrb[20].mxu0 %vm643_vm2, %v2765_v0  ;;  %v2777_v0 = vsel %vm2301_vm4, %v2774_v28, %v2776_v50  ;;  %v3100_v28 = vshrl.u32 %v6827_v45, 16  ;;  %v3118_v50 = vshrl.u32 %v6849_v18, 16 }
 0x169   : > { %5251 = vmatprep.mubr.msk.bf16.mxu0 %vm643_vm2, %v2767_v48  ;;  %v3078_v48 = vrot.slane %v3076_v3, 3  ;;  %v3087_v41 = vrot.slane %v3085_v13, 3  ;;  %v1552_v3 = vrot.slane %v5855_v35, 1  ;;  %v5856_v13 = vld [vmem:[%s6377_s27 + $0x40] sm:$0xff]  }
 0x16a   : > { %v3102_v5 = vrot.slane %v3100_v28, 2  ;;  %v1554_v58 = vrot.slane %v5856_v13, 1 }
 0x16b   : > { %v3079_v24 = vor.u32 %v3078_v48, %v3075_v37 }
 0x16d   : > { %v3080_v38 = vsel %vm3054_vm6, %v3070_v34, %v3079_v24 }
 0x16e   : > { %5100 = vmatmul.mubr.msk.bf16.gmra.mrb[24].mxu1 %vm643_vm2, %v1130_v1  ;;  %v5852_v1 = vld [vmem:[%s6377_s27 + $0x20] sm:$0xff]  }
 0x16f   : > { %5103 = vmatprep.mubr.msk.bf16.mxu1 %vm643_vm2, %v1132_v25  ;;  %v1546_v27 = vrot.slane %v5852_v1, 1  ;;  %v3071_v25 = vsel %vm3054_vm6, %v3062_v15, %v3070_v34  ;;  %v3111_v34 = vrot.slane %v3109_v61, 2 }
 0x170   : > { %5252 = vmatmul.mubr.msk.bf16.gmra.mrb[24].mxu0 %vm643_vm2, %v2769_v51  ;;  %v1545_v51 = vsel %vm1101_vm5, %v1542_v14, %v1544_v63  ;;  %v3105_v14 = vrot.slane %v3103_v36, 3  ;;  %v5858_v36 = vld [vmem:[%s6377_s27 + $0x50] sm:$0xff]  }
 0x171   : > { %5255 = vmatprep.mubr.msk.bf16.mxu0 %vm643_vm2, %v2771_v17  ;;  %v1547_v17 = vsel %vm1101_vm5, %v1544_v63, %v1546_v27  ;;  %v1549_v9 = vsel %vm1101_vm5, %v1546_v27, %v1548_v30  ;;  %v3115_v1 = vor.u32 %v3114_v44, %v3111_v34  ;;  %v1555_v27 = vsel %vm1101_vm5, %v1552_v3, %v1554_v58 }
 0x172   : > { %v1558_v10 = vrot.slane %v5858_v36, 1 }
 0x176   : > { %5104 = vmatmul.mubr.msk.bf16.gmra.mrb[28].mxu1 %vm643_vm2, %v1134_v19  ;;  %v3091_v19 = vshrl.u32 %v6820_v59, 16 }
 0x177   : > { %5107 = vmatprep.mubr.msk.bf16.mxu1 %vm643_vm2, %v1136_v52  ;;  %v3088_v52 = vor.u32 %v3087_v41, %v3084_v12  ;;  %v3130_v12 = vshll.u32 %v6862_v26, 16 }
 0x178   : > { %5256 = vmatmul.mubr.msk.bf16.gmra.mrb[28].mxu0 %vm643_vm2, %v2773_v40  ;;  %v3093_v54 = vrot.slane %v3091_v19, 2  ;;  %v3096_v40 = vrot.slane %v3094_v31, 3 }
 0x179   : > { %5259 = vmatprep.mubr.msk.bf16.mxu0 %vm643_vm2, %v2775_v4  ;;  %v5854_v4 = vld [vmem:[%s6377_s27 + $0x30] sm:$0xff]   ;;  %v3089_v11 = vsel %vm3054_vm6, %v3079_v24, %v3088_v52  ;;  %v3139_v24 = vshll.u32 %v6867_v39, 16  ;;  %v3132_v28 = vrot.slane %v3130_v12, 3 }
 0x17a   : > { %v1550_v42 = vrot.slane %v5854_v4, 1  ;;  %v3097_v7 = vor.u32 %v3096_v40, %v3093_v54 }
 0x17b   : > { %v3141_v54 = vrot.slane %v3139_v24, 3 }
 0x17c   : > { %v1551_v8 = vsel %vm1101_vm5, %v1548_v30, %v1550_v42  ;;  %v3098_v15 = vsel %vm3054_vm6, %v3088_v52, %v3097_v7  ;;  %v1553_v48 = vsel %vm1101_vm5, %v1550_v42, %v1552_v3 }
 0x17e   : > { %5108 = vmatmul.mubr.msk.bf16.gmra.mrb[32].mxu1 %vm643_vm2, %v1138_v60  ;;  %v3106_v60 = vor.u32 %v3105_v14, %v3102_v5  ;;  %v3154_v14 = vshrl.u32 %v6885_v6, 16 }
 0x17f   : > { %5113 = vmatprep.mubr.msk.bf16.mxu1 %vm643_vm2, %v1543_v22  ;;  %v3121_v22 = vshll.u32 %v6849_v18, 16 }
 0x180   : > { %5260 = vmatmul.mubr.msk.bf16.gmra.mrb[32].mxu0 %vm643_vm2, %v2777_v0  ;;  %v3107_v63 = vsel %vm3054_vm6, %v3097_v7, %v3106_v60  ;;  %v3120_v0 = vrot.slane %v3118_v50, 2  ;;  %v3116_v31 = vsel %vm3054_vm6, %v3106_v60, %v3115_v1  ;;  %v5859_v7 = vld [vmem:[%s6377_s27 + $0x58] sm:$0xff]   ;;  %v5860_v50 = vld [vmem:[%s6377_s27 + $0x60] sm:$0xff]   ;;  %v3156_v3 = vrot.slane %v3154_v14, 2 }
 0x181   : > { %5265 = vmatprep.mubr.msk.bf16.mxu0 %vm643_vm2, %v3071_v25  ;;  %v3123_v37 = vrot.slane %v3121_v22, 3  ;;  %v3127_v25 = vshrl.u32 %v6862_v26, 16  ;;  %v1562_v22 = vrot.slane %v5860_v50, 1  ;;  %v1570_v14 = vrot.slane %v6595_v47, 1 }
 0x182   : > { %v3199_v50 = vshrl.u32 %v6934_v21, 16  ;;  %v3208_v47 = vshrl.u32 %v6938_v32, 16 }
 0x183   : > { %v3124_v41 = vor.u32 %v3123_v37, %v3120_v0  ;;  %v3129_v52 = vrot.slane %v3127_v25, 2  ;;  %v3172_v37 = vshrl.u32 %v6903_v49, 16 }
 0x185   : > { %v3125_v30 = vsel %vm3054_vm6, %v3115_v1, %v3124_v41  ;;  %v3133_v4 = vor.u32 %v3132_v28, %v3129_v52  ;;  %v5861_v1 = vld [vmem:[%s6377_s27 + $0x68] sm:$0xff]  }
 0x186   : > { %5114 = vmatmul.mubr.msk.bf16.vlgmr.msra.gmra.mrb[0].mxu1 %vm643_vm2, %v1545_v51  ;;  %v3136_v51 = vshrl.u32 %v6867_v39, 16 }
 0x187   : > { %5117 = vmatprep.mubr.msk.bf16.mxu1 %vm643_vm2, %v1547_v17  ;;  %v5857_v17 = vld [vmem:[%s6377_s27 + $0x48] sm:$0xff]   ;;  %v3134_v61 = vsel %vm3054_vm6, %v3124_v41, %v3133_v4 }
 0x188   : > { %5266 = vmatmul.mubr.msk.bf16.vlgmr.msra.gmra.mrb[0].mxu0 %vm643_vm2, %v3080_v38  ;;  %v1556_v19 = vrot.slane %v5857_v17, 1  ;;  %v3138_v38 = vrot.slane %v3136_v51, 2  ;;  %v5862_v51 = vld [vmem:[%s6377_s27 + $0x70] sm:$0xff]  }
 0x189   : > { %5302 = vmatpush3.bf16.msra.mxu0 %v3594_v62  ;;  %5269 = vmatprep.mubr.msk.bf16.mxu0 %vm643_vm2, %v3089_v11  ;;  %v3145_v62 = vshrl.u32 %v6880_v43, 16  ;;  %v3148_v11 = vshll.u32 %v6880_v43, 16  ;;  %v1566_v24 = vrot.slane %v5862_v51, 1  ;;  %v3495_v51 = vld [vmem:[%s6377_s27 + $0x10] sm:$0x8] }
 0x18a   : > { %v1557_v40 = vsel %vm1101_vm5, %v1554_v58, %v1556_v19  ;;  %v1559_v42 = vsel %vm1101_vm5, %v1556_v19, %v1558_v10  ;;  %v3142_v5 = vor.u32 %v3141_v54, %v3138_v38  ;;  %v3163_v58 = vshrl.u32 %v6898_v29, 16 }
 0x18b   : > { %v3147_v33 = vrot.slane %v3145_v62, 2  ;;  %v3150_v60 = vrot.slane %v3148_v11, 3  ;;  %v3174_v19 = vrot.slane %v3172_v37, 2  ;;  %v3190_v54 = vshrl.u32 %v6921_v53, 16 }
 0x18c   : > { %v3143_v35 = vsel %vm3054_vm6, %v3133_v4, %v3142_v5  ;;  %v3165_v12 = vrot.slane %v3163_v58, 2  ;;  %v5863_v4 = vld [vmem:[%s6377_s27 + $0x78] sm:$0xff]   ;;  %v1574_v58 = vrot.slane %v6626_v56, 1  ;;  %v3210_v37 = vrot.slane %v3208_v47, 2 }
 0x18d   : > { %v3151_v44 = vor.u32 %v3150_v60, %v3147_v33 }
 0x18e   : > { %5118 = vmatmul.mubr.msk.bf16.gmra.mrb[4].mxu1 %vm643_vm2, %v1549_v9  ;;  %v3157_v9 = vshll.u32 %v6885_v6, 16 }
 0x18f   : > { %5121 = vmatprep.mubr.msk.bf16.mxu1 %vm643_vm2, %v1551_v8  ;;  %v1560_v8 = vrot.slane %v5859_v7, 1  ;;  %v3152_v25 = vsel %vm3054_vm6, %v3142_v5, %v3151_v44  ;;  %v3192_v7 = vrot.slane %v3190_v54, 2 }
 0x190   : > { %5270 = vmatmul.mubr.msk.bf16.gmra.mrb[4].mxu0 %vm643_vm2, %v3098_v15  ;;  %v3159_v15 = vrot.slane %v3157_v9, 3 }
 0x191   : > { %5273 = vmatprep.mubr.msk.bf16.mxu0 %vm643_vm2, %v3107_v63  ;;  %v1561_v34 = vsel %vm1101_vm5, %v1558_v10, %v1560_v8  ;;  %v1563_v13 = vsel %vm1101_vm5, %v1560_v8, %v1562_v22  ;;  %v3166_v63 = vshll.u32 %v6898_v29, 16  ;;  %v3181_v10 = vshrl.u32 %v6916_v23, 16 }
 0x192   : > { %v3160_v0 = vor.u32 %v3159_v15, %v3156_v3  ;;  %v3211_v3 = vshll.u32 %v6938_v32, 16  ;;  %v1572_v15 = vrot.slane %v6614_v20, 1 }
 0x193   : > { %v3168_v41 = vrot.slane %v3166_v63, 3  ;;  %v3183_v11 = vrot.slane %v3181_v10, 2  ;;  %v7073_v63 = vld [vmem:[%s6377_s27 + $0xa0] ss:$0 sps:$4 sm:$0x77]  }
 0x194   : > { %v3161_v17 = vsel %vm3054_vm6, %v3151_v44, %v3160_v0  ;;  %v3201_v44 = vrot.slane %v3199_v50, 2  ;;  %v3220_v56 = vshll.u32 %v7073_v63, 16  ;;  %v3527_v50 = vrot.slane %v6903_v49, 3 }
 0x195   : > { %v3169_v28 = vor.u32 %v3168_v41, %v3165_v12  ;;  %v3217_v12 = vshrl.u32 %v7073_v63, 16 }
 0x196   : > { %5122 = vmatmul.mubr.msk.bf16.gmra.mrb[8].mxu1 %vm643_vm2, %v1553_v48  ;;  %v3175_v48 = vshll.u32 %v6903_v49, 16  ;;  %v3535_v49 = vrot.slane %v6938_v32, 3 }
 0x197   : > { %5125 = vmatprep.mubr.msk.bf16.mxu1 %vm643_vm2, %v1555_v27  ;;  %v1564_v27 = vrot.slane %v5861_v1, 1  ;;  %v3170_v62 = vsel %vm3054_vm6, %v3160_v0, %v3169_v28  ;;  %v1573_v1 = vsel %vm1101_vm5, %v1570_v14, %v1572_v15 }
 0x198   : > { %5274 = vmatmul.mubr.msk.bf16.gmra.mrb[8].mxu0 %vm643_vm2, %v3116_v31  ;;  %v3177_v31 = vrot.slane %v3175_v48, 3  ;;  %v3213_v48 = vrot.slane %v3211_v3, 3 }
 0x199   : > { %5277 = vmatprep.mubr.msk.bf16.mxu0 %vm643_vm2, %v3125_v30  ;;  %v1565_v52 = vsel %vm1101_vm5, %v1562_v22, %v1564_v27  ;;  %v1567_v36 = vsel %vm1101_vm5, %v1564_v27, %v1566_v24  ;;  %v3184_v30 = vshll.u32 %v6916_v23, 16  ;;  %v3202_v22 = vshll.u32 %v6934_v21, 16  ;;  %v5846_v27 = vld [vmem:[%s6377_s27 + $0x98] ss:$0 sps:$4 sm:$0x11]  }
 0x19a   : > { %v3178_v38 = vor.u32 %v3177_v31, %v3174_v19  ;;  %v3214_v41 = vor.u32 %v3213_v48, %v3210_v37  ;;  %v3219_v19 = vrot.slane %v3217_v12, 2  ;;  %v3222_v31 = vrot.slane %v3220_v56, 3 }
 0x19b   : > { %v3186_v5 = vrot.slane %v3184_v30, 3 }
 0x19c   : > { %v3179_v9 = vsel %vm3054_vm6, %v3169_v28, %v3178_v38  ;;  %v4764_v28 = vcombine.low %v3495_v51, %v6774_v16  ;;  %v3223_v10 = vor.u32 %v3222_v31, %v3219_v19  ;;  %v3505_v16 = vrot.slane %v6799_v57, 3 }
 0x19d   : > { %v3187_v33 = vor.u32 %v3186_v5, %v3183_v11  ;;  %v3511_v11 = vrot.slane %v6827_v45, 3  ;;  %v3513_v57 = vrot.slane %v6844_v2, 3  ;;  %v3519_v45 = vrot.slane %v6867_v39, 3 }
 0x19e   : > { %5126 = vmatmul.mubr.msk.bf16.gmra.mrb[12].mxu1 %vm643_vm2, %v1557_v40  ;;  %v3193_v40 = vshll.u32 %v6921_v53, 16  ;;  %v3502_v30 = vrot.slane %v4764_v28, 3  ;;  %v3224_v54 = vsel %vm3054_vm6, %v3214_v41, %v3223_v10  ;;  %v3521_v2 = vrot.slane %v6880_v43, 3 }
 0x19f   : > { %5129 = vmatprep.mubr.msk.bf16.mxu1 %vm643_vm2, %v1559_v42  ;;  %v1568_v42 = vrot.slane %v5863_v4, 1  ;;  %v3507_v4 = vrot.slane %v6804_v46, 3  ;;  %v3515_v46 = vrot.slane %v6849_v18, 3  ;;  %v5849_v18 = vld [vmem:[#allocation9] sm:$0xff]   ;;  %v3525_v39 = vrot.slane %v6898_v29, 3 }
 0x1a0   : > { %5278 = vmatmul.mubr.msk.bf16.gmra.mrb[12].mxu0 %vm643_vm2, %v3134_v61  ;;  %v3195_v8 = vrot.slane %v3193_v40, 3  ;;  %5339 = vmatprep.subr.bf16.mxu1 %v5849_v18  ;;  %v3533_v29 = vrot.slane %v6934_v21, 3 }
 0x1a1   : > { %5281 = vmatprep.mubr.msk.bf16.mxu0 %vm643_vm2, %v3143_v35  ;;  %v1569_v61 = vsel %vm1101_vm5, %v1566_v24, %v1568_v42  ;;  %v1571_v60 = vsel %vm1101_vm5, %v1568_v42, %v1570_v14  ;;  %v1576_v24 = vrot.slane %v5846_v27, 1  ;;  %5340 = vmatpush3.bf16.msra.mxu1 %v5849_v18  ;;  %v3528_v43 = vsel %vm3501_vm7, %v3525_v39, %v3527_v50 }
 0x1a2   : > { %v3196_v35 = vor.u32 %v3195_v8, %v3192_v7  ;;  %v3516_v7 = vsel %vm3501_vm7, %v3513_v57, %v3515_v46 }
 0x1a4   : > { %v3197_v0 = vsel %vm3054_vm6, %v3187_v33, %v3196_v35 }
 0x1a6   : > { %5130 = vmatmul.mubr.msk.bf16.gmra.mrb[16].mxu1 %vm643_vm2, %v1561_v34  ;;  %v3188_v34 = vsel %vm3054_vm6, %v3178_v38, %v3187_v33  ;;  %v3503_v38 = vrot.slane %v6787_v55, 3  ;;  %v3509_v55 = vrot.slane %v6820_v59, 3  ;;  %v3517_v59 = vrot.slane %v6862_v26, 3 }
 0x1a7   : > { %5133 = vmatprep.mubr.msk.bf16.mxu1 %vm643_vm2, %v1563_v13  ;;  %v3204_v13 = vrot.slane %v3202_v22, 3  ;;  %v3523_v33 = vrot.slane %v6885_v6, 3  ;;  %v3529_v6 = vrot.slane %v6916_v23, 3  ;;  %v3537_v23 = vrot.slane %v7073_v63, 3 }
 0x1a8   : > { %5282 = vmatmul.mubr.msk.bf16.gmra.mrb[16].mxu0 %vm643_vm2, %v3152_v25  ;;  %v1575_v25 = vsel %vm1101_vm5, %v1572_v15, %v1574_v58  ;;  %v3504_v40 = vsel %vm3501_vm7, %v3502_v30, %v3503_v38  ;;  %v3506_v42 = vsel %vm3501_vm7, %v3503_v38, %v3505_v16  ;;  %v3510_v5 = vsel %vm3501_vm7, %v3507_v4, %v3509_v55 }
 0x1a9   : > { %5285 = vmatprep.mubr.msk.bf16.mxu0 %vm643_vm2, %v3161_v17  ;;  %v3205_v20 = vor.u32 %v3204_v13, %v3201_v44  ;;  %v3512_v14 = vsel %vm3501_vm7, %v3509_v55, %v3511_v11  ;;  %v3518_v8 = vsel %vm3501_vm7, %v3515_v46, %v3517_v59  ;;  %v3524_v26 = vsel %vm3501_vm7, %v3521_v2, %v3523_v33 }
 0x1aa   : > { %v3526_v22 = vsel %vm3501_vm7, %v3523_v33, %v3525_v39  ;;  %v3530_v47 = vsel %vm3501_vm7, %v3527_v50, %v3529_v6  ;;  %v6105_v44 = vmov 0.0  }
 0x1ab   : > { %v3206_v17 = vsel %vm3054_vm6, %v3196_v35, %v3205_v20  ;;  %v3531_v35 = vrot.slane %v6921_v53, 3  ;;  %v3538_v53 = vsel %vm3501_vm7, %v3535_v49, %v3537_v23  ;;  %327 = vst.msk [vmem:[#allocation2 + $0x10] sm:$0xff] %vm324_vm8, %v6105_v44  ;;  %325 = vst.msk [vmem:[#allocation2] sm:$0xff] %vm324_vm8, %v6105_v44 }
 0x1ac   : > { %326 = vst.msk [vmem:[#allocation2 + $0x8] sm:$0xff] %vm324_vm8, %v6105_v44  ;;  %328 = vst.msk [vmem:[#allocation2 + $0x18] sm:$0xff] %vm324_vm8, %v6105_v44 }
 0x1ad   : > { %v3532_v3 = vsel %vm3501_vm7, %v3529_v6, %v3531_v35  ;;  %v3534_v15 = vsel %vm3501_vm7, %v3531_v35, %v3533_v29  ;;  %329 = vst.msk [vmem:[#allocation2 + $0x20] sm:$0xff] %vm324_vm8, %v6105_v44  ;;  %330 = vst.msk [vmem:[#allocation2 + $0x28] sm:$0xff] %vm324_vm8, %v6105_v44 }
 0x1ae   : > { %5134 = vmatmul.mubr.msk.bf16.gmra.mrb[20].mxu1 %vm643_vm2, %v1565_v52  ;;  %v3215_v52 = vsel %vm3054_vm6, %v3205_v20, %v3214_v41  ;;  %331 = vst.msk [vmem:[#allocation2 + $0x30] sm:$0xff] %vm324_vm8, %v6105_v44  ;;  %332 = vst.msk [vmem:[#allocation2 + $0x38] sm:$0xff] %vm324_vm8, %v6105_v44 }
 0x1af   : > { %5137 = vmatprep.mubr.msk.bf16.mxu1 %vm643_vm2, %v1567_v36  ;;  %v1577_v36 = vsel %vm1101_vm5, %v1574_v58, %v1576_v24  ;;  %333 = vst.msk [vmem:[#allocation2 + $0x40] sm:$0xff] %vm324_vm8, %v6105_v44  ;;  %334 = vst.msk [vmem:[#allocation2 + $0x48] sm:$0xff] %vm324_vm8, %v6105_v44 }
 0x1b0   : > { %5286 = vmatmul.mubr.msk.bf16.gmra.mrb[20].mxu0 %vm643_vm2, %v3170_v62  ;;  %v3508_v62 = vsel %vm3501_vm7, %v3505_v16, %v3507_v4  ;;  %335 = vst.msk [vmem:[#allocation2 + $0x50] sm:$0xff] %vm324_vm8, %v6105_v44  ;;  %336 = vst.msk [vmem:[#allocation2 + $0x58] sm:$0xff] %vm324_vm8, %v6105_v44 }
 0x1b1   : > { %5289 = vmatprep.mubr.msk.bf16.mxu0 %vm643_vm2, %v3179_v9  ;;  %v3514_v9 = vsel %vm3501_vm7, %v3511_v11, %v3513_v57  ;;  %337 = vst.msk [vmem:[#allocation2 + $0x60] sm:$0xff] %vm324_vm8, %v6105_v44  ;;  %338 = vst.msk [vmem:[#allocation2 + $0x68] sm:$0xff] %vm324_vm8, %v6105_v44 }
 0x1b2   : > { %339 = vst.msk [vmem:[#allocation2 + $0x70] sm:$0xff] %vm324_vm8, %v6105_v44  ;;  %340 = vst.msk [vmem:[#allocation2 + $0x78] sm:$0xff] %vm324_vm8, %v6105_v44  ;;  %v3811_v46 = vld [vmem:[#allocation2 + $0x10] sm:$0xff] }
 0x1b3   : > { %341 = vst.msk [vmem:[#allocation2 + $0x80] sm:$0xff] %vm324_vm8, %v6105_v44  ;;  %342 = vst.msk [vmem:[#allocation2 + $0x88] sm:$0xff] %vm324_vm8, %v6105_v44 }
 0x1b4   : > { %343 = vst.msk [vmem:[#allocation2 + $0x90] sm:$0xff] %vm324_vm8, %v6105_v44  ;;  %344 = vst.msk [vmem:[#allocation2 + $0x98] sm:$0xff] %vm324_vm8, %v6105_v44 }
 0x1b5   : > { %345 = vst.msk [vmem:[#allocation2 + $0xa0] sm:$0xff] %vm324_vm8, %v6105_v44  ;;  %346 = vst.msk [vmem:[#allocation2 + $0xa8] sm:$0xff] %vm324_vm8, %v6105_v44  ;;  %v3815_v6 = vld [vmem:[#allocation2 + $0x30] sm:$0xff] }
 0x1b6   : > { %5138 = vmatmul.mubr.msk.bf16.gmra.mrb[24].mxu1 %vm643_vm2, %v1569_v61  ;;  %v3520_v61 = vsel %vm3501_vm7, %v3517_v59, %v3519_v45  ;;  %347 = vst.msk [vmem:[#allocation2 + $0xb0] sm:$0xff] %vm324_vm8, %v6105_v44  ;;  %348 = vst.msk [vmem:[#allocation2 + $0xb8] sm:$0xff] %vm324_vm8, %v6105_v44  ;;  %v3809_v59 = vld [vmem:[#allocation2] sm:$0xff] }
 0x1b7   : > { %5141 = vmatprep.mubr.msk.bf16.mxu1 %vm643_vm2, %v1571_v60  ;;  %v3522_v60 = vsel %vm3501_vm7, %v3519_v45, %v3521_v2  ;;  %349 = vst.msk [vmem:[#allocation2 + $0xc0] sm:$0xff] %vm324_vm8, %v6105_v44  ;;  %350 = vst.msk [vmem:[#allocation2 + $0xc8] sm:$0xff] %vm324_vm8, %v6105_v44 }
 0x1b8   : > { %5290 = vmatmul.mubr.msk.bf16.gmra.mrb[24].mxu0 %vm643_vm2, %v3188_v34  ;;  %v3536_v34 = vsel %vm3501_vm7, %v3533_v29, %v3535_v49  ;;  %351 = vst.msk [vmem:[#allocation2 + $0xd0] sm:$0xff] %vm324_vm8, %v6105_v44  ;;  %352 = vst.msk [vmem:[#allocation2 + $0xd8] sm:$0xff] %vm324_vm8, %v6105_v44 }
 0x1b9   : > { %5293 = vmatprep.mubr.msk.bf16.mxu0 %vm643_vm2, %v3197_v0  ;;  %353 = vst.msk [vmem:[#allocation2 + $0xe0] sm:$0xff] %vm324_vm8, %v6105_v44  ;;  %354 = vst.msk [vmem:[#allocation2 + $0xe8] sm:$0xff] %vm324_vm8, %v6105_v44 }
 0x1ba   : > { %355 = vst.msk [vmem:[#allocation2 + $0xf0] sm:$0xff] %vm324_vm8, %v6105_v44  ;;  %356 = vst.msk [vmem:[#allocation2 + $0xf8] sm:$0xff] %vm324_vm8, %v6105_v44 }
 0x1bb   : > { %357 = vst.msk [vmem:[#allocation2 + $0x100] sm:$0xff] %vm324_vm8, %v6105_v44  ;;  %358 = vst.msk [vmem:[#allocation2 + $0x108] sm:$0xff] %vm324_vm8, %v6105_v44 }
 0x1bc   : > { %359 = vst.msk [vmem:[#allocation2 + $0x110] sm:$0xff] %vm324_vm8, %v6105_v44  ;;  %360 = vst.msk [vmem:[#allocation2 + $0x118] sm:$0xff] %vm324_vm8, %v6105_v44 }
 0x1be   : > { %5142 = vmatmul.mubr.msk.bf16.gmra.mrb[28].mxu1 %vm643_vm2, %v1573_v1 }
 0x1bf   : > { %5145 = vmatprep.mubr.msk.bf16.mxu1 %vm643_vm2, %v1575_v25 }
 0x1c0   : > { %5294 = vmatmul.mubr.msk.bf16.gmra.mrb[28].mxu0 %vm643_vm2, %v3206_v17 }
 0x1c1   : > { %5297 = vmatprep.mubr.msk.bf16.mxu0 %vm643_vm2, %v3215_v52 }
 0x1c6   : > { %5146 = vmatmul.mubr.msk.bf16.gmra.mrb[32].mxu1 %vm643_vm2, %v1577_v36 }
 0x1c8   : > { %5298 = vmatmul.mubr.msk.bf16.gmra.mrb[32].mxu0 %vm643_vm2, %v3224_v54 }
 0x1c9   : > { %5303 = vmatprep.mubr.msk.bf16.mxu0 %vm643_vm2, %v3504_v40 }
 0x1d0   : > { %5304 = vmatmul.mubr.msk.bf16.vlgmr.msra.gmra.mrb[0].mxu0 %vm643_vm2, %v3506_v42 }
 0x1d1   : > { %5307 = vmatprep.mubr.msk.bf16.mxu0 %vm643_vm2, %v3508_v62 }
 0x1d8   : > { %5308 = vmatmul.mubr.msk.bf16.gmra.mrb[4].mxu0 %vm643_vm2, %v3510_v5 }
 0x1d9   : > { %5311 = vmatprep.mubr.msk.bf16.mxu0 %vm643_vm2, %v3512_v14 }
 0x1e0   : > { %5312 = vmatmul.mubr.msk.bf16.gmra.mrb[8].mxu0 %vm643_vm2, %v3514_v9 }
 0x1e1   : > { %5315 = vmatprep.mubr.msk.bf16.mxu0 %vm643_vm2, %v3516_v7 }
 0x1e8   : > { %5316 = vmatmul.mubr.msk.bf16.gmra.mrb[12].mxu0 %vm643_vm2, %v3518_v8 }
 0x1e9   : > { %5319 = vmatprep.mubr.msk.bf16.mxu0 %vm643_vm2, %v3520_v61  ;;  %v3812_v61 = vld [vmem:[#allocation2 + $0x18] sm:$0xff] }
 0x1f0   : > { %5320 = vmatmul.mubr.msk.bf16.gmra.mrb[16].mxu0 %vm643_vm2, %v3522_v60  ;;  %v3810_v60 = vld [vmem:[#allocation2 + $0x8] sm:$0xff] }
 0x1f1   : > { %5323 = vmatprep.mubr.msk.bf16.mxu0 %vm643_vm2, %v3524_v26 }
 0x1f8   : > { %5324 = vmatmul.mubr.msk.bf16.gmra.mrb[20].mxu0 %vm643_vm2, %v3526_v22 }
 0x1f9   : > { %5327 = vmatprep.mubr.msk.bf16.mxu0 %vm643_vm2, %v3528_v43 }
 0x200   : > { %5328 = vmatmul.mubr.msk.bf16.gmra.mrb[24].mxu0 %vm643_vm2, %v3530_v47 }
 0x201   : > { %5331 = vmatprep.mubr.msk.bf16.mxu0 %vm643_vm2, %v3532_v3  ;;  %v3813_v3 = vld [vmem:[#allocation2 + $0x20] sm:$0xff] }
 0x208   : > { %5332 = vmatmul.mubr.msk.bf16.gmra.mrb[28].mxu0 %vm643_vm2, %v3534_v15  ;;  %v3816_v15 = vld [vmem:[#allocation2 + $0x38] sm:$0xff] }
 0x209   : > { %5335 = vmatprep.mubr.msk.bf16.mxu0 %vm643_vm2, %v3536_v34  ;;  %v7247_v34 = vld [vmem:[#allocation8] ss:$0 sm:$0xff] }
 0x210   : > { %5336 = vmatmul.mubr.msk.bf16.gmra.mrb[32].mxu0 %vm643_vm2, %v3538_v53 }
 0x259   : > { %v5115_v21 = vpop.f32.mrb[0].mxu1 }
 0x25a   : > { %v1669_v32 = vpop.f32.mrb[1].mxu1 }
 0x25b   : > { %v5116_v13 = vpop.f32.mrb[2].mxu1 }
 0x25c   : > { %v1672_v58 = vpop.f32.mrb[3].mxu1 }
 0x261   : > { %v5119_v63 = vpop.f32.mrb[4].mxu1 }
 0x262   : > { %v1685_v0 = vpop.f32.mrb[5].mxu1 }
 0x263   : > { %v5120_v37 = vpop.f32.mrb[6].mxu1 }
 0x264   : > { %v7185_v48 = vpop.f32.mrb[7].mxu1 }
 0x269   : > { %v7187_v1 = vpop.f32.mrb[8].mxu1 }
 0x26a   : > { %v7189_v27 = vpop.f32.mrb[9].mxu1 }
 0x26b   : > { %v7191_v20 = vpop.f32.mrb[10].mxu1 }
 0x26c   : > { %v7193_v25 = vpop.f32.mrb[11].mxu1 }
 0x271   : > { %v7195_v12 = vpop.f32.mrb[12].mxu1 }
 0x272   : > { %v7197_v56 = vpop.f32.mrb[13].mxu1 }
 0x273   : > { %v7199_v41 = vpop.f32.mrb[14].mxu1 }
 0x274   : > { %v7201_v51 = vpop.f32.mrb[15].mxu1 }
 0x279   : > { %v7203_v24 = vpop.f32.mrb[16].mxu1 }
 0x27a   : > { %v7205_v17 = vpop.f32.mrb[17].mxu1 }
 0x27b   : > { %v7207_v19 = vpop.f32.mrb[18].mxu1 }
 0x27c   : > { %v7209_v31 = vpop.f32.mrb[19].mxu1 }
 0x281   : > { %v7211_v52 = vpop.f32.mrb[20].mxu1 }
 0x282   : > { %v7213_v28 = vpop.f32.mrb[21].mxu1 }
 0x283   : > { %v7215_v36 = vpop.f32.mrb[22].mxu1 }
 0x284   : > { %v7217_v10 = vpop.f32.mrb[23].mxu1 }
 0x289   : > { %v7219_v30 = vpop.f32.mrb[24].mxu1 }
 0x28a   : > { %v7221_v38 = vpop.f32.mrb[25].mxu1 }
 0x28b   : > { %v7223_v54 = vpop.f32.mrb[26].mxu1 }
 0x28c   : > { %v7225_v40 = vpop.f32.mrb[27].mxu1 }
 0x291   : > { %v7227_v16 = vpop.f32.mrb[28].mxu1 }
 0x292   : > { %v7229_v4 = vpop.f32.mrb[29].mxu1 }
 0x293   : > { %v7231_v42 = vpop.f32.mrb[30].mxu1 }
 0x294   : > { %v7233_v62 = vpop.f32.mrb[31].mxu1 }
 0x299   : > { %v7235_v55 = vpop.f32.mrb[32].mxu1 }
 0x29a   : > { %v7237_v11 = vpop.f32.mrb[33].mxu1 }
 0x29b   : > { %v7239_v5 = vpop.f32.mrb[34].mxu1 }
 0x29c   : > { %v7241_v14 = vpop.f32.mrb[35].mxu1 }
 0x2a3   : > { %v5305_v57 = vpop.f32.mrb[0].mxu0 }
 0x2a4   : > { %v5377_v9 = vadd.f32 %v5305_v57, %v5115_v21  ;;  %v3630_v7 = vpop.f32.mrb[1].mxu0  ;;  %v3814_v21 = vld [vmem:[#allocation2 + $0x28] sm:$0xff] }
 0x2a5   : > { %v5378_v45 = vadd.f32 %v3630_v7, %v1669_v32  ;;  %v5306_v8 = vpop.f32.mrb[2].mxu0 }
 0x2a6   : > { %v3847_v2 = vadd.f32 %v5377_v9, %v3811_v46  ;;  %v5379_v18 = vadd.f32 %v5306_v8, %v5116_v13  ;;  %v3633_v33 = vpop.f32.mrb[3].mxu0 }
 0x2a7   : > { %v3845_v26 = vadd.f32 %v5378_v45, %v3809_v59  ;;  %v5380_v39 = vadd.f32 %v3633_v33, %v1672_v58  ;;  %v3819_v45 = vld [vmem:[#allocation2 + $0x50] sm:$0xff] }
 0x2a8   : > { %3884 = vst.msk [vmem:[#allocation2 + $0x10] sm:$0xff] %vm324_vm8, %v3847_v2  ;;  %v3848_v50 = vadd.f32 %v5379_v18, %v3812_v61 }
 0x2a9   : > { %3882 = vst.msk [vmem:[#allocation2] sm:$0xff] %vm324_vm8, %v3845_v26  ;;  %v3846_v22 = vadd.f32 %v5380_v39, %v3810_v60  ;;  %v3817_v60 = vld [vmem:[#allocation2 + $0x40] sm:$0xff] }
 0x2aa   : > { %3885 = vst.msk [vmem:[#allocation2 + $0x18] sm:$0xff] %vm324_vm8, %v3848_v50 }
 0x2ab   : > { %3883 = vst.msk [vmem:[#allocation2 + $0x8] sm:$0xff] %vm324_vm8, %v3846_v22  ;;  %v5309_v43 = vpop.f32.mrb[4].mxu0  ;;  %v3820_v22 = vld [vmem:[#allocation2 + $0x58] sm:$0xff] }
 0x2ac   : > { %v5381_v35 = vadd.f32 %v5309_v43, %v5119_v63  ;;  %v3646_v47 = vpop.f32.mrb[5].mxu0 }
 0x2ad   : > { %v5382_v29 = vadd.f32 %v3646_v47, %v1685_v0  ;;  %v5310_v49 = vpop.f32.mrb[6].mxu0 }
 0x2ae   : > { %v3851_v23 = vadd.f32 %v5381_v35, %v3815_v6  ;;  %v5383_v53 = vadd.f32 %v5310_v49, %v5120_v37  ;;  %v3649_v44 = vpop.f32.mrb[7].mxu0 }
 0x2af   : > { %v3849_v32 = vadd.f32 %v5382_v29, %v3813_v3  ;;  %v5384_v13 = vadd.f32 %v3649_v44, %v7185_v48  ;;  %v3923_v58 = vld [vmem:[#allocation2 + $0x10] sm:$0xff]  ;;  %v3818_v3 = vld [vmem:[#allocation2 + $0x48] sm:$0xff] }
 0x2b0   : > { %3888 = vst.msk [vmem:[#allocation2 + $0x30] sm:$0xff] %vm324_vm8, %v3851_v23  ;;  %v3852_v57 = vadd.f32 %v5383_v53, %v3816_v15  ;;  %v3921_v46 = vld [vmem:[#allocation2] sm:$0xff]  ;;  %v3966_v63 = vadd.f32 %v7247_v34, %v3923_v58 }
 0x2b1   : > { %3886 = vst.msk [vmem:[#allocation2 + $0x20] sm:$0xff] %vm324_vm8, %v3849_v32  ;;  %v3850_v0 = vadd.f32 %v5384_v13, %v3814_v21  ;;  %v3964_v9 = vadd.f32 %v7247_v34, %v3921_v46  ;;  %v3924_v7 = vld [vmem:[#allocation2 + $0x18] sm:$0xff] }
 0x2b2   : > { %3889 = vst.msk [vmem:[#allocation2 + $0x38] sm:$0xff] %vm324_vm8, %v3852_v57  ;;  %v3922_v37 = vld [vmem:[#allocation2 + $0x8] sm:$0xff]  ;;  %v3967_v59 = vadd.f32 %v7247_v34, %v3924_v7  ;;  %v4038_v2 = vmul.f32 0.01, %v3966_v63  ;;  %vm4002_vm12 = vcmp.gt.f32.partialorder %v3966_v63, 0.0 }
 0x2b3   : > { %3887 = vst.msk [vmem:[#allocation2 + $0x28] sm:$0xff] %vm324_vm8, %v3850_v0  ;;  %v5313_v48 = vpop.f32.mrb[8].mxu0  ;;  %v3965_v8 = vadd.f32 %v7247_v34, %v3922_v37  ;;  %v4036_v61 = vmul.f32 0.01, %v3964_v9  ;;  %vm4000_vm9 = vcmp.gt.f32.partialorder %v3964_v9, 0.0 }
 0x2b4   : > { %v5385_v18 = vadd.f32 %v5313_v48, %v7187_v1  ;;  %v3662_v33 = vpop.f32.mrb[9].mxu0  ;;  %vm4003_vm10 = vcmp.gt.f32.partialorder %v3967_v59, 0.0  ;;  %v4039_v26 = vmul.f32 0.01, %v3967_v59  ;;  %v4074_v21 = vsel %vm4002_vm12, %v3966_v63, %v4038_v2 }
 0x2b5   : > { %v5386_v39 = vadd.f32 %v3662_v33, %v7189_v27  ;;  %v5314_v50 = vpop.f32.mrb[10].mxu0  ;;  %vm4001_vm11 = vcmp.gt.f32.partialorder %v3965_v8, 0.0  ;;  %v4037_v43 = vmul.f32 0.01, %v3965_v8  ;;  %v4072_v15 = vsel %vm4000_vm9, %v3964_v9, %v4036_v61  ;;  %v3823_v9 = vld [vmem:[#allocation2 + $0x70] sm:$0xff]  ;;  %v3824_v33 = vld [vmem:[#allocation2 + $0x78] sm:$0xff] }
 0x2b6   : > { %v3855_v6 = vadd.f32 %v5385_v18, %v3819_v45  ;;  %v5387_v35 = vadd.f32 %v5314_v50, %v7191_v20  ;;  %v3665_v47 = vpop.f32.mrb[11].mxu0  ;;  %v4075_v29 = vsel %vm4003_vm10, %v3967_v59, %v4039_v26 }
 0x2b7   : > { %v3853_v49 = vadd.f32 %v5386_v39, %v3817_v60  ;;  %v5388_v1 = vadd.f32 %v3665_v47, %v7193_v25  ;;  %v4073_v23 = vsel %vm4001_vm11, %v3965_v8, %v4037_v43  ;;  %v3927_v53 = vld [vmem:[#allocation2 + $0x30] sm:$0xff]  ;;  %v4109_v58 = vpack.c.bf16 %v4075_v29, %v4074_v21  ;;  %v3821_v8 = vld [vmem:[#allocation2 + $0x60] sm:$0xff] }
 0x2b8   : > { %3892 = vst.msk [vmem:[#allocation2 + $0x50] sm:$0xff] %vm324_vm8, %v3855_v6  ;;  %v3856_v27 = vadd.f32 %v5387_v35, %v3820_v22  ;;  %v4108_v44 = vpack.c.bf16 %v4073_v23, %v4072_v15  ;;  %v3925_v32 = vld [vmem:[#allocation2 + $0x20] sm:$0xff]  ;;  %v3970_v13 = vadd.f32 %v7247_v34, %v3927_v53  ;;  %v3822_v22 = vld [vmem:[#allocation2 + $0x68] sm:$0xff] }
 0x2b9   : > { %3890 = vst.msk [vmem:[#allocation2 + $0x40] sm:$0xff] %vm324_vm8, %v3853_v49  ;;  %v3854_v20 = vadd.f32 %v5388_v1, %v3818_v3  ;;  %v3968_v57 = vadd.f32 %v7247_v34, %v3925_v32  ;;  %v3928_v46 = vld [vmem:[#allocation2 + $0x38] sm:$0xff]  ;;  %v3827_v32 = vld [vmem:[#allocation2 + $0x90] sm:$0xff] }
 0x2ba   : > { %3893 = vst.msk [vmem:[#allocation2 + $0x58] sm:$0xff] %vm324_vm8, %v3856_v27  ;;  %5341 = vmatprep.mubr.msk.bf16.mxu1 %vm324_vm8, %v4108_v44  ;;  %v3926_v25 = vld [vmem:[#allocation2 + $0x28] sm:$0xff]  ;;  %v3971_v0 = vadd.f32 %v7247_v34, %v3928_v46  ;;  %v4042_v59 = vmul.f32 0.01, %v3970_v13  ;;  %vm4006_vm0 = vcmp.gt.f32.partialorder %v3970_v13, 0.0 }
 0x2bb   : > { %3891 = vst.msk [vmem:[#allocation2 + $0x48] sm:$0xff] %vm324_vm8, %v3854_v20  ;;  %v5317_v63 = vpop.f32.mrb[12].mxu0  ;;  %5342 = vmatmul.mubr.msk.bf16.vlgmr.msra.gmra.mrb[36].mxu1 %vm324_vm8, %v4109_v58  ;;  %v3969_v7 = vadd.f32 %v7247_v34, %v3926_v25  ;;  %v4040_v37 = vmul.f32 0.01, %v3968_v57  ;;  %vm4004_vm13 = vcmp.gt.f32.partialorder %v3968_v57, 0.0  ;;  %v3825_v25 = vld [vmem:[#allocation2 + $0x80] sm:$0xff] }
 0x2bc   : > { %v5389_v48 = vadd.f32 %v5317_v63, %v7195_v12  ;;  %v3678_v45 = vpop.f32.mrb[13].mxu0  ;;  %vm4007_vm14 = vcmp.gt.f32.partialorder %v3971_v0, 0.0  ;;  %v4043_v61 = vmul.f32 0.01, %v3971_v0  ;;  %v4078_v49 = vsel %vm4006_vm0, %v3970_v13, %v4042_v59 }
 0x2bd   : > { %v5390_v2 = vadd.f32 %v3678_v45, %v7197_v56  ;;  %v5318_v18 = vpop.f32.mrb[14].mxu0  ;;  %vm4005_vm15 = vcmp.gt.f32.partialorder %v3969_v7, 0.0  ;;  %v4041_v60 = vmul.f32 0.01, %v3969_v7  ;;  %v4076_v35 = vsel %vm4004_vm13, %v3968_v57, %v4040_v37 }
 0x2be   : > { %v3859_v26 = vadd.f32 %v5389_v48, %v3823_v9  ;;  %v5391_v39 = vadd.f32 %v5318_v18, %v7199_v41  ;;  %v3681_v50 = vpop.f32.mrb[15].mxu0  ;;  %v4079_v43 = vsel %vm4007_vm14, %v3971_v0, %v4043_v61 }
 0x2bf   : > { %v3857_v6 = vadd.f32 %v5390_v2, %v3821_v8  ;;  %v5392_v12 = vadd.f32 %v3681_v50, %v7201_v51  ;;  %v4077_v47 = vsel %vm4005_vm15, %v3969_v7, %v4041_v60  ;;  %v3931_v3 = vld [vmem:[#allocation2 + $0x50] sm:$0xff]  ;;  %v4111_v23 = vpack.c.bf16 %v4079_v43, %v4078_v49  ;;  %v3828_v7 = vld [vmem:[#allocation2 + $0x98] sm:$0xff]  ;;  %v3826_v8 = vld [vmem:[#allocation2 + $0x88] sm:$0xff] }
 0x2c0   : > { %3896 = vst.msk [vmem:[#allocation2 + $0x70] sm:$0xff] %vm324_vm8, %v3859_v26  ;;  %v3860_v56 = vadd.f32 %v5391_v39, %v3824_v33  ;;  %v4110_v29 = vpack.c.bf16 %v4077_v47, %v4076_v35  ;;  %v3929_v1 = vld [vmem:[#allocation2 + $0x40] sm:$0xff]  ;;  %v3974_v15 = vadd.f32 %v7247_v34, %v3931_v3  ;;  %v3831_v3 = vld [vmem:[#allocation2 + $0xb0] sm:$0xff] }
 0x2c1   : > { %3894 = vst.msk [vmem:[#allocation2 + $0x60] sm:$0xff] %vm324_vm8, %v3857_v6  ;;  %v3858_v41 = vadd.f32 %v5392_v12, %v3822_v22  ;;  %v3972_v53 = vadd.f32 %v7247_v34, %v3929_v1  ;;  %v3932_v27 = vld [vmem:[#allocation2 + $0x58] sm:$0xff] }
 0x2c2   : > { %3897 = vst.msk [vmem:[#allocation2 + $0x78] sm:$0xff] %vm324_vm8, %v3860_v56  ;;  %5345 = vmatprep.mubr.msk.bf16.mxu1 %vm324_vm8, %v4110_v29  ;;  %v3930_v51 = vld [vmem:[#allocation2 + $0x48] sm:$0xff]  ;;  %v3975_v44 = vadd.f32 %v7247_v34, %v3932_v27  ;;  %v4046_v58 = vmul.f32 0.01, %v3974_v15  ;;  %vm4010_vm4 = vcmp.gt.f32.partialorder %v3974_v15, 0.0 }
 0x2c3   : > { %3895 = vst.msk [vmem:[#allocation2 + $0x68] sm:$0xff] %vm324_vm8, %v3858_v41  ;;  %v5321_v21 = vpop.f32.mrb[16].mxu0  ;;  %5346 = vmatmul.mubr.msk.bf16.gmra.mrb[40].mxu1 %vm324_vm8, %v4111_v23  ;;  %v3973_v13 = vadd.f32 %v7247_v34, %v3930_v51  ;;  %v4044_v20 = vmul.f32 0.01, %v3972_v53  ;;  %vm4008_vm1 = vcmp.gt.f32.partialorder %v3972_v53, 0.0  ;;  %v3829_v41 = vld [vmem:[#allocation2 + $0xa0] sm:$0xff] }
 0x2c4   : > { %v5393_v57 = vadd.f32 %v5321_v21, %v7203_v24  ;;  %v3694_v46 = vpop.f32.mrb[17].mxu0  ;;  %vm4011_vm2 = vcmp.gt.f32.partialorder %v3975_v44, 0.0  ;;  %v4047_v0 = vmul.f32 0.01, %v3975_v44  ;;  %v4082_v39 = vsel %vm4010_vm4, %v3974_v15, %v4046_v58  ;;  %v3832_v51 = vld [vmem:[#allocation2 + $0xb8] sm:$0xff] }
 0x2c5   : > { %v5394_v63 = vadd.f32 %v3694_v46, %v7205_v17  ;;  %v5322_v9 = vpop.f32.mrb[18].mxu0  ;;  %vm4009_vm3 = vcmp.gt.f32.partialorder %v3973_v13, 0.0  ;;  %v4045_v37 = vmul.f32 0.01, %v3973_v13  ;;  %v4080_v18 = vsel %vm4008_vm1, %v3972_v53, %v4044_v20  ;;  %v3830_v20 = vld [vmem:[#allocation2 + $0xa8] sm:$0xff] }
 0x2c6   : > { %v3863_v59 = vadd.f32 %v5393_v57, %v3827_v32  ;;  %v5395_v48 = vadd.f32 %v5322_v9, %v7207_v19  ;;  %v3697_v45 = vpop.f32.mrb[19].mxu0  ;;  %v4083_v61 = vsel %vm4011_vm2, %v3975_v44, %v4047_v0 }
 0x2c7   : > { %v3861_v2 = vadd.f32 %v5394_v63, %v3825_v25  ;;  %v5396_v24 = vadd.f32 %v3697_v45, %v7209_v31  ;;  %v4081_v33 = vsel %vm4009_vm3, %v3973_v13, %v4045_v37  ;;  %v3935_v60 = vld [vmem:[#allocation2 + $0x70] sm:$0xff]  ;;  %v4113_v43 = vpack.c.bf16 %v4083_v61, %v4082_v39 }
 0x2c8   : > { %3900 = vst.msk [vmem:[#allocation2 + $0x90] sm:$0xff] %vm324_vm8, %v3863_v59  ;;  %v3864_v17 = vadd.f32 %v5395_v48, %v3828_v7  ;;  %v4112_v26 = vpack.c.bf16 %v4081_v33, %v4080_v18  ;;  %v3933_v50 = vld [vmem:[#allocation2 + $0x60] sm:$0xff]  ;;  %v3978_v22 = vadd.f32 %v7247_v34, %v3935_v60 }
 0x2c9   : > { %3898 = vst.msk [vmem:[#allocation2 + $0x80] sm:$0xff] %vm324_vm8, %v3861_v2  ;;  %v3862_v19 = vadd.f32 %v5396_v24, %v3826_v8  ;;  %v3976_v6 = vadd.f32 %v7247_v34, %v3933_v50  ;;  %v3936_v12 = vld [vmem:[#allocation2 + $0x78] sm:$0xff]  ;;  %v3835_v2 = vld [vmem:[#allocation2 + $0xd0] sm:$0xff] }
 0x2ca   : > { %3901 = vst.msk [vmem:[#allocation2 + $0x98] sm:$0xff] %vm324_vm8, %v3864_v17  ;;  %5349 = vmatprep.mubr.msk.bf16.mxu1 %vm324_vm8, %v4112_v26  ;;  %v3934_v31 = vld [vmem:[#allocation2 + $0x68] sm:$0xff]  ;;  %v3979_v35 = vadd.f32 %v7247_v34, %v3936_v12  ;;  %v4050_v49 = vmul.f32 0.01, %v3978_v22  ;;  %vm4014_vm9 = vcmp.gt.f32.partialorder %v3978_v22, 0.0  ;;  %v3833_v26 = vld [vmem:[#allocation2 + $0xc0] sm:$0xff] }
 0x2cb   : > { %3899 = vst.msk [vmem:[#allocation2 + $0x88] sm:$0xff] %vm324_vm8, %v3862_v19  ;;  %v5325_v47 = vpop.f32.mrb[20].mxu0  ;;  %5350 = vmatmul.mubr.msk.bf16.gmra.mrb[44].mxu1 %vm324_vm8, %v4113_v43  ;;  %v3977_v56 = vadd.f32 %v7247_v34, %v3934_v31  ;;  %v4048_v29 = vmul.f32 0.01, %v3976_v6  ;;  %vm4012_vm5 = vcmp.gt.f32.partialorder %v3976_v6, 0.0  ;;  %v3836_v19 = vld [vmem:[#allocation2 + $0xd8] sm:$0xff] }
 0x2cc   : > { %v5397_v1 = vadd.f32 %v5325_v47, %v7211_v52  ;;  %v3710_v15 = vpop.f32.mrb[21].mxu0  ;;  %vm4015_vm6 = vcmp.gt.f32.partialorder %v3979_v35, 0.0  ;;  %v4051_v23 = vmul.f32 0.01, %v3979_v35  ;;  %v4086_v9 = vsel %vm4014_vm9, %v3978_v22, %v4050_v49 }
 0x2cd   : > { %v5398_v53 = vadd.f32 %v3710_v15, %v7213_v28  ;;  %v5326_v27 = vpop.f32.mrb[22].mxu0  ;;  %vm4013_vm7 = vcmp.gt.f32.partialorder %v3977_v56, 0.0  ;;  %v4049_v44 = vmul.f32 0.01, %v3977_v56  ;;  %v4084_v46 = vsel %vm4012_vm5, %v3976_v6, %v4048_v29 }
 0x2ce   : > { %v3867_v21 = vadd.f32 %v5397_v1, %v3831_v3  ;;  %v5399_v32 = vadd.f32 %v5326_v27, %v7215_v36  ;;  %v3713_v13 = vpop.f32.mrb[23].mxu0  ;;  %v4087_v58 = vsel %vm4015_vm6, %v3979_v35, %v4051_v23  ;;  %v3834_v35 = vld [vmem:[#allocation2 + $0xc8] sm:$0xff] }
 0x2cf   : > { %v3865_v57 = vadd.f32 %v5398_v53, %v3829_v41  ;;  %v5400_v52 = vadd.f32 %v3713_v13, %v7217_v10  ;;  %v4085_v25 = vsel %vm4013_vm7, %v3977_v56, %v4049_v44  ;;  %v3939_v0 = vld [vmem:[#allocation2 + $0x90] sm:$0xff]  ;;  %v4115_v59 = vpack.c.bf16 %v4087_v58, %v4086_v9 }
 0x2d0   : > { %3904 = vst.msk [vmem:[#allocation2 + $0xb0] sm:$0xff] %vm324_vm8, %v3867_v21  ;;  %v3868_v28 = vadd.f32 %v5399_v32, %v3832_v51  ;;  %v4114_v63 = vpack.c.bf16 %v4085_v25, %v4084_v46  ;;  %v3937_v7 = vld [vmem:[#allocation2 + $0x80] sm:$0xff]  ;;  %v3982_v37 = vadd.f32 %v7247_v34, %v3939_v0  ;;  %v3839_v32 = vld [vmem:[#allocation2 + $0xf0] sm:$0xff] }
 0x2d1   : > { %3902 = vst.msk [vmem:[#allocation2 + $0xa0] sm:$0xff] %vm324_vm8, %v3865_v57  ;;  %v3866_v36 = vadd.f32 %v5400_v52, %v3830_v20  ;;  %v3980_v48 = vadd.f32 %v7247_v34, %v3937_v7  ;;  %v3940_v45 = vld [vmem:[#allocation2 + $0x98] sm:$0xff]  ;;  %v3837_v46 = vld [vmem:[#allocation2 + $0xe0] sm:$0xff] }
 0x2d2   : > { %3905 = vst.msk [vmem:[#allocation2 + $0xb8] sm:$0xff] %vm324_vm8, %v3868_v28  ;;  %5353 = vmatprep.mubr.msk.bf16.mxu1 %vm324_vm8, %v4114_v63  ;;  %v3938_v10 = vld [vmem:[#allocation2 + $0x88] sm:$0xff]  ;;  %v3983_v8 = vadd.f32 %v7247_v34, %v3940_v45  ;;  %v4054_v33 = vmul.f32 0.01, %v3982_v37  ;;  %vm4018_vm13 = vcmp.gt.f32.partialorder %v3982_v37, 0.0  ;;  %v3840_v63 = vld [vmem:[#allocation2 + $0xf8] sm:$0xff] }
 0x2d3   : > { %3903 = vst.msk [vmem:[#allocation2 + $0xa8] sm:$0xff] %vm324_vm8, %v3866_v36  ;;  %v5329_v61 = vpop.f32.mrb[24].mxu0  ;;  %5354 = vmatmul.mubr.msk.bf16.gmra.mrb[48].mxu1 %vm324_vm8, %v4115_v59  ;;  %v3981_v24 = vadd.f32 %v7247_v34, %v3938_v10  ;;  %v4052_v18 = vmul.f32 0.01, %v3980_v48  ;;  %vm4016_vm10 = vcmp.gt.f32.partialorder %v3980_v48, 0.0  ;;  %v3838_v59 = vld [vmem:[#allocation2 + $0xe8] sm:$0xff] }
 0x2d4   : > { %v5401_v60 = vadd.f32 %v5329_v61, %v7219_v30  ;;  %v3726_v17 = vpop.f32.mrb[25].mxu0  ;;  %vm4019_vm11 = vcmp.gt.f32.partialorder %v3983_v8, 0.0  ;;  %v4055_v39 = vmul.f32 0.01, %v3983_v8  ;;  %v4090_v15 = vsel %vm4018_vm13, %v3982_v37, %v4054_v33 }
 0x2d5   : > { %v5402_v50 = vadd.f32 %v3726_v17, %v7221_v38  ;;  %v5330_v22 = vpop.f32.mrb[26].mxu0  ;;  %vm4017_vm12 = vcmp.gt.f32.partialorder %v3981_v24, 0.0  ;;  %v4053_v43 = vmul.f32 0.01, %v3981_v24  ;;  %v4088_v56 = vsel %vm4016_vm10, %v3980_v48, %v4052_v18 }
 0x2d6   : > { %v3871_v6 = vadd.f32 %v5401_v60, %v3835_v2  ;;  %v5403_v12 = vadd.f32 %v5330_v22, %v7223_v54  ;;  %v3729_v31 = vpop.f32.mrb[27].mxu0  ;;  %v4091_v47 = vsel %vm4019_vm11, %v3983_v8, %v4055_v39  ;;  %v3843_v22 = vld [vmem:[#allocation2 + $0x110] sm:$0xff] }
 0x2d7   : > { %v3869_v3 = vadd.f32 %v5402_v50, %v3833_v26  ;;  %v5404_v30 = vadd.f32 %v3729_v31, %v7225_v40  ;;  %v4089_v29 = vsel %vm4017_vm12, %v3981_v24, %v4053_v43  ;;  %v3943_v49 = vld [vmem:[#allocation2 + $0xb0] sm:$0xff]  ;;  %v4117_v53 = vpack.c.bf16 %v4091_v47, %v4090_v15  ;;  %v3842_v15 = vld [vmem:[#allocation2 + $0x108] sm:$0xff] }
 0x2d8   : > { %3908 = vst.msk [vmem:[#allocation2 + $0xd0] sm:$0xff] %vm324_vm8, %v3871_v6  ;;  %v3872_v38 = vadd.f32 %v5403_v12, %v3836_v19  ;;  %v4116_v1 = vpack.c.bf16 %v4089_v29, %v4088_v56  ;;  %v3941_v41 = vld [vmem:[#allocation2 + $0xa0] sm:$0xff]  ;;  %v3986_v23 = vadd.f32 %v7247_v34, %v3943_v49  ;;  %v3844_v56 = vld [vmem:[#allocation2 + $0x118] sm:$0xff] }
 0x2d9   : > { %3906 = vst.msk [vmem:[#allocation2 + $0xc0] sm:$0xff] %vm324_vm8, %v3869_v3  ;;  %v3870_v54 = vadd.f32 %v5404_v30, %v3834_v35  ;;  %v3984_v27 = vadd.f32 %v7247_v34, %v3941_v41  ;;  %v3944_v51 = vld [vmem:[#allocation2 + $0xb8] sm:$0xff]  ;;  %v3841_v35 = vld [vmem:[#allocation2 + $0x100] sm:$0xff] }
 0x2da   : > { %3909 = vst.msk [vmem:[#allocation2 + $0xd8] sm:$0xff] %vm324_vm8, %v3872_v38  ;;  %5357 = vmatprep.mubr.msk.bf16.mxu1 %vm324_vm8, %v4116_v1  ;;  %v3942_v40 = vld [vmem:[#allocation2 + $0xa8] sm:$0xff]  ;;  %v3987_v44 = vadd.f32 %v7247_v34, %v3944_v51  ;;  %v4058_v58 = vmul.f32 0.01, %v3986_v23  ;;  %vm4022_vm1 = vcmp.gt.f32.partialorder %v3986_v23, 0.0 }
 0x2db   : > { %3907 = vst.msk [vmem:[#allocation2 + $0xc8] sm:$0xff] %vm324_vm8, %v3870_v54  ;;  %v5333_v21 = vpop.f32.mrb[28].mxu0  ;;  %5358 = vmatmul.mubr.msk.bf16.gmra.mrb[52].mxu1 %vm324_vm8, %v4117_v53  ;;  %v3985_v13 = vadd.f32 %v7247_v34, %v3942_v40  ;;  %v4056_v20 = vmul.f32 0.01, %v3984_v27  ;;  %vm4020_vm14 = vcmp.gt.f32.partialorder %v3984_v27, 0.0 }
 0x2dc   : > { %v5405_v57 = vadd.f32 %v5333_v21, %v7227_v16  ;;  %v3742_v52 = vpop.f32.mrb[29].mxu0  ;;  %vm4023_vm15 = vcmp.gt.f32.partialorder %v3987_v44, 0.0  ;;  %v4059_v25 = vmul.f32 0.01, %v3987_v44  ;;  %v4094_v24 = vsel %vm4022_vm1, %v3986_v23, %v4058_v58 }
 0x2dd   : > { %v5406_v0 = vadd.f32 %v3742_v52, %v7229_v4  ;;  %v5334_v28 = vpop.f32.mrb[30].mxu0  ;;  %vm4021_vm0 = vcmp.gt.f32.partialorder %v3985_v13, 0.0  ;;  %v4057_v9 = vmul.f32 0.01, %v3985_v13  ;;  %v4092_v10 = vsel %vm4020_vm14, %v3984_v27, %v4056_v20 }
 0x2de   : > { %v3875_v7 = vadd.f32 %v5405_v57, %v3839_v32  ;;  %v5407_v37 = vadd.f32 %v5334_v28, %v7231_v42  ;;  %v3745_v36 = vpop.f32.mrb[31].mxu0  ;;  %v4095_v48 = vsel %vm4023_vm15, %v3987_v44, %v4059_v25 }
 0x2df   : > { %v3873_v45 = vadd.f32 %v5406_v0, %v3837_v46  ;;  %v5408_v16 = vadd.f32 %v3745_v36, %v7233_v62  ;;  %v4093_v8 = vsel %vm4021_vm0, %v3985_v13, %v4057_v9  ;;  %v3947_v61 = vld [vmem:[#allocation2 + $0xd0] sm:$0xff]  ;;  %v4119_v60 = vpack.c.bf16 %v4095_v48, %v4094_v24 }
 0x2e0   : > { %3912 = vst.msk [vmem:[#allocation2 + $0xf0] sm:$0xff] %vm324_vm8, %v3875_v7  ;;  %v3876_v4 = vadd.f32 %v5407_v37, %v3840_v63  ;;  %v4118_v2 = vpack.c.bf16 %v4093_v8, %v4092_v10  ;;  %v3945_v18 = vld [vmem:[#allocation2 + $0xc0] sm:$0xff]  ;;  %v3990_v33 = vadd.f32 %v7247_v34, %v3947_v61 }
 0x2e1   : > { %3910 = vst.msk [vmem:[#allocation2 + $0xe0] sm:$0xff] %vm324_vm8, %v3873_v45  ;;  %v3874_v42 = vadd.f32 %v5408_v16, %v3838_v59  ;;  %v3988_v17 = vadd.f32 %v7247_v34, %v3945_v18  ;;  %v3948_v26 = vld [vmem:[#allocation2 + $0xd8] sm:$0xff] }
 0x2e2   : > { %3913 = vst.msk [vmem:[#allocation2 + $0xf8] sm:$0xff] %vm324_vm8, %v3876_v4  ;;  %5361 = vmatprep.mubr.msk.bf16.mxu1 %vm324_vm8, %v4118_v2  ;;  %v3946_v62 = vld [vmem:[#allocation2 + $0xc8] sm:$0xff]  ;;  %v3991_v39 = vadd.f32 %v7247_v34, %v3948_v26  ;;  %v4062_v6 = vmul.f32 0.01, %v3990_v33  ;;  %vm4026_vm5 = vcmp.gt.f32.partialorder %v3990_v33, 0.0 }
 0x2e3   : > { %3911 = vst.msk [vmem:[#allocation2 + $0xe8] sm:$0xff] %vm324_vm8, %v3874_v42  ;;  %v5337_v50 = vpop.f32.mrb[32].mxu0  ;;  %5362 = vmatmul.mubr.msk.bf16.gmra.mrb[56].mxu1 %vm324_vm8, %v4119_v60  ;;  %v3989_v19 = vadd.f32 %v7247_v34, %v3946_v62  ;;  %v4060_v43 = vmul.f32 0.01, %v3988_v17  ;;  %vm4024_vm2 = vcmp.gt.f32.partialorder %v3988_v17, 0.0 }
 0x2e4   : > { %v5409_v12 = vadd.f32 %v5337_v50, %v7235_v55  ;;  %v3758_v31 = vpop.f32.mrb[33].mxu0  ;;  %vm4027_vm3 = vcmp.gt.f32.partialorder %v3991_v39, 0.0  ;;  %v4063_v47 = vmul.f32 0.01, %v3991_v39  ;;  %v4098_v40 = vsel %vm4026_vm5, %v3990_v33, %v4062_v6 }
 0x2e5   : > { %v5410_v3 = vadd.f32 %v3758_v31, %v7237_v11  ;;  %v5338_v30 = vpop.f32.mrb[34].mxu0  ;;  %vm4025_vm4 = vcmp.gt.f32.partialorder %v3989_v19, 0.0  ;;  %v4061_v29 = vmul.f32 0.01, %v3989_v19  ;;  %v4096_v54 = vsel %vm4024_vm2, %v3988_v17, %v4060_v43 }
 0x2e6   : > { %v3879_v49 = vadd.f32 %v5409_v12, %v3843_v22  ;;  %v5411_v38 = vadd.f32 %v5338_v30, %v7239_v5  ;;  %v3761_v1 = vpop.f32.mrb[35].mxu0  ;;  %v4099_v41 = vsel %vm4027_vm3, %v3991_v39, %v4063_v47 }
 0x2e7   : > { %v3877_v23 = vadd.f32 %v5410_v3, %v3841_v35  ;;  %v5412_v55 = vadd.f32 %v3761_v1, %v7241_v14  ;;  %v4097_v53 = vsel %vm4025_vm4, %v3989_v19, %v4061_v29  ;;  %v3951_v27 = vld [vmem:[#allocation2 + $0xf0] sm:$0xff]  ;;  %v4121_v32 = vpack.c.bf16 %v4099_v41, %v4098_v40 }
 0x2e8   : > { %3916 = vst.msk [vmem:[#allocation2 + $0x110] sm:$0xff] %vm324_vm8, %v3879_v49  ;;  %v3880_v11 = vadd.f32 %v5411_v38, %v3844_v56  ;;  %v4120_v51 = vpack.c.bf16 %v4097_v53, %v4096_v54  ;;  %v3949_v44 = vld [vmem:[#allocation2 + $0xe0] sm:$0xff]  ;;  %v3994_v21 = vadd.f32 %v7247_v34, %v3951_v27 }
 0x2e9   : > { %3914 = vst.msk [vmem:[#allocation2 + $0x100] sm:$0xff] %vm324_vm8, %v3877_v23  ;;  %v3878_v5 = vadd.f32 %v5412_v55, %v3842_v15  ;;  %v3992_v13 = vadd.f32 %v7247_v34, %v3949_v44  ;;  %v3952_v20 = vld [vmem:[#allocation2 + $0xf8] sm:$0xff] }
 0x2ea   : > { %3917 = vst.msk [vmem:[#allocation2 + $0x118] sm:$0xff] %vm324_vm8, %v3880_v11  ;;  %5365 = vmatprep.mubr.msk.bf16.mxu1 %vm324_vm8, %v4120_v51  ;;  %v3950_v14 = vld [vmem:[#allocation2 + $0xe8] sm:$0xff]  ;;  %v3995_v58 = vadd.f32 %v7247_v34, %v3952_v20  ;;  %v4066_v46 = vmul.f32 0.01, %v3994_v21  ;;  %vm4030_vm10 = vcmp.gt.f32.partialorder %v3994_v21, 0.0 }
 0x2eb   : > { %3915 = vst.msk [vmem:[#allocation2 + $0x108] sm:$0xff] %vm324_vm8, %v3878_v5  ;;  %5366 = vmatmul.mubr.msk.bf16.gmra.mrb[60].mxu1 %vm324_vm8, %v4121_v32  ;;  %v3993_v57 = vadd.f32 %v7247_v34, %v3950_v14  ;;  %v4064_v52 = vmul.f32 0.01, %v3992_v13  ;;  %vm4028_vm6 = vcmp.gt.f32.partialorder %v3992_v13, 0.0 }
 0x2ec   : > { %vm4031_vm7 = vcmp.gt.f32.partialorder %v3995_v58, 0.0  ;;  %v4067_v25 = vmul.f32 0.01, %v3995_v58  ;;  %v4102_v36 = vsel %vm4030_vm10, %v3994_v21, %v4066_v46 }
 0x2ed   : > { %vm4029_vm9 = vcmp.gt.f32.partialorder %v3993_v57, 0.0  ;;  %v4065_v0 = vmul.f32 0.01, %v3993_v57  ;;  %v4100_v63 = vsel %vm4028_vm6, %v3992_v13, %v4064_v52 }
 0x2ee   : > { %v4103_v28 = vsel %vm4031_vm7, %v3995_v58, %v4067_v25 }
 0x2ef   : > { %v4101_v9 = vsel %vm4029_vm9, %v3993_v57, %v4065_v0  ;;  %v3955_v7 = vld [vmem:[#allocation2 + $0x110] sm:$0xff]  ;;  %v4123_v45 = vpack.c.bf16 %v4103_v28, %v4102_v36 }
 0x2f0   : > { %v4122_v37 = vpack.c.bf16 %v4101_v9, %v4100_v63  ;;  %v3953_v59 = vld [vmem:[#allocation2 + $0x100] sm:$0xff]  ;;  %v3998_v48 = vadd.f32 %v7247_v34, %v3955_v7 }
 0x2f1   : > { %v3996_v16 = vadd.f32 %v7247_v34, %v3953_v59  ;;  %v3956_v10 = vld [vmem:[#allocation2 + $0x118] sm:$0xff] }
 0x2f2   : > { %5369 = vmatprep.mubr.msk.bf16.mxu1 %vm324_vm8, %v4122_v37  ;;  %v3954_v8 = vld [vmem:[#allocation2 + $0x108] sm:$0xff]  ;;  %v3999_v61 = vadd.f32 %v7247_v34, %v3956_v10  ;;  %v4070_v24 = vmul.f32 0.01, %v3998_v48  ;;  %vm4034_vm14 = vcmp.gt.f32.partialorder %v3998_v48, 0.0 }
 0x2f3   : > { %5370 = vmatmul.mubr.msk.bf16.gmra.mrb[64].mxu1 %vm324_vm8, %v4123_v45  ;;  %v3997_v4 = vadd.f32 %v7247_v34, %v3954_v8  ;;  %v4068_v2 = vmul.f32 0.01, %v3996_v16  ;;  %vm4032_vm11 = vcmp.gt.f32.partialorder %v3996_v16, 0.0  ;;  %v7372_v34 = vld [vmem:[#allocation11] ss:$0 sm:$0xff] }
 0x2f4   : > { %vm4035_vm12 = vcmp.gt.f32.partialorder %v3999_v61, 0.0  ;;  %v4071_v18 = vmul.f32 0.01, %v3999_v61  ;;  %v4106_v62 = vsel %vm4034_vm14, %v3998_v48, %v4070_v24 }
 0x2f5   : > { %vm4033_vm13 = vcmp.gt.f32.partialorder %v3997_v4, 0.0  ;;  %v4069_v33 = vmul.f32 0.01, %v3997_v4  ;;  %v4104_v60 = vsel %vm4032_vm11, %v3996_v16, %v4068_v2 }
 0x2f6   : > { %v4107_v42 = vsel %vm4035_vm12, %v3999_v61, %v4071_v18 }
 0x2f7   : > { %v4105_v17 = vsel %vm4033_vm13, %v3997_v4, %v4069_v33  ;;  %v4125_v39 = vpack.c.bf16 %v4107_v42, %v4106_v62 }
 0x2f8   : > { %v4124_v26 = vpack.c.bf16 %v4105_v17, %v4104_v60 }
 0x2fa   : > { %5373 = vmatprep.mubr.msk.bf16.mxu1 %vm324_vm8, %v4124_v26 }
 0x2fb   : > { %5374 = vmatmul.mubr.msk.bf16.gmra.mrb[68].mxu1 %vm324_vm8, %v4125_v39 }
 0x38e   : > { %v5343_v50 = vpop.f32.mrb[36].mxu1 }
 0x38f   : > { %v4238_v22 = vadd.f32 %v5343_v50, %v7372_v34  ;;  %v4229_v19 = vpop.f32.mrb[37].mxu1 }
 0x390   : > { %v4230_v43 = vadd.f32 %v7372_v34, %v4229_v19  ;;  %v5344_v6 = vpop.f32.mrb[38].mxu1 }
 0x391   : > { %4374 = vst [vmem:[%s7376_s28 + $0x10] sm:$0xff] %v4238_v22  ;;  %v4241_v12 = vadd.f32 %v5344_v6, %v7372_v34  ;;  %v4232_v31 = vpop.f32.mrb[39].mxu1 }
 0x392   : > { %4372 = vst [vmem:[%s7376_s28] sm:$0xff] %v4230_v43  ;;  %v4233_v35 = vadd.f32 %v7372_v34, %v4232_v31 }
 0x393   : > { %4375 = vst [vmem:[%s7376_s28 + $0x18] sm:$0xff] %v4241_v12 }
 0x394   : > { %4373 = vst [vmem:[%s7376_s28 + $0x8] sm:$0xff] %v4233_v35 }
 0x396   : > { %v5347_v47 = vpop.f32.mrb[40].mxu1 }
 0x397   : > { %v4254_v3 = vadd.f32 %v5347_v47, %v7372_v34  ;;  %v4245_v30 = vpop.f32.mrb[41].mxu1 }
 0x398   : > { %v4246_v56 = vadd.f32 %v7372_v34, %v4245_v30  ;;  %v5348_v29 = vpop.f32.mrb[42].mxu1 }
 0x399   : > { %4378 = vst [vmem:[%s7376_s28 + $0x30] sm:$0xff] %v4254_v3  ;;  %v4257_v49 = vadd.f32 %v5348_v29, %v7372_v34  ;;  %v4248_v38 = vpop.f32.mrb[43].mxu1 }
 0x39a   : > { %4376 = vst [vmem:[%s7376_s28 + $0x20] sm:$0xff] %v4246_v56  ;;  %v4249_v1 = vadd.f32 %v7372_v34, %v4248_v38 }
 0x39b   : > { %4379 = vst [vmem:[%s7376_s28 + $0x38] sm:$0xff] %v4257_v49 }
 0x39c   : > { %4377 = vst [vmem:[%s7376_s28 + $0x28] sm:$0xff] %v4249_v1 }
 0x39e   : > { %v5351_v15 = vpop.f32.mrb[44].mxu1 }
 0x39f   : > { %v4270_v41 = vadd.f32 %v5351_v15, %v7372_v34  ;;  %v4261_v23 = vpop.f32.mrb[45].mxu1 }
 0x3a0   : > { %v4262_v55 = vadd.f32 %v7372_v34, %v4261_v23  ;;  %v5352_v54 = vpop.f32.mrb[46].mxu1 }
 0x3a1   : > { %4382 = vst [vmem:[%s7376_s28 + $0x50] sm:$0xff] %v4270_v41  ;;  %v4273_v53 = vadd.f32 %v5352_v54, %v7372_v34  ;;  %v4264_v27 = vpop.f32.mrb[47].mxu1 }
 0x3a2   : > { %4380 = vst [vmem:[%s7376_s28 + $0x40] sm:$0xff] %v4262_v55  ;;  %v4265_v11 = vadd.f32 %v7372_v34, %v4264_v27 }
 0x3a3   : > { %4383 = vst [vmem:[%s7376_s28 + $0x58] sm:$0xff] %v4273_v53 }
 0x3a4   : > { %4381 = vst [vmem:[%s7376_s28 + $0x48] sm:$0xff] %v4265_v11 }
 0x3a6   : > { %v5355_v51 = vpop.f32.mrb[48].mxu1 }
 0x3a7   : > { %v4286_v40 = vadd.f32 %v5355_v51, %v7372_v34  ;;  %v4277_v44 = vpop.f32.mrb[49].mxu1 }
 0x3a8   : > { %v4278_v21 = vadd.f32 %v7372_v34, %v4277_v44  ;;  %v5356_v5 = vpop.f32.mrb[50].mxu1 }
 0x3a9   : > { %4386 = vst [vmem:[%s7376_s28 + $0x70] sm:$0xff] %v4286_v40  ;;  %v4289_v32 = vadd.f32 %v5356_v5, %v7372_v34  ;;  %v4280_v13 = vpop.f32.mrb[51].mxu1 }
 0x3aa   : > { %4384 = vst [vmem:[%s7376_s28 + $0x60] sm:$0xff] %v4278_v21  ;;  %v4281_v20 = vadd.f32 %v7372_v34, %v4280_v13 }
 0x3ab   : > { %4387 = vst [vmem:[%s7376_s28 + $0x78] sm:$0xff] %v4289_v32 }
 0x3ac   : > { %4385 = vst [vmem:[%s7376_s28 + $0x68] sm:$0xff] %v4281_v20 }
 0x3ae   : > { %v5359_v14 = vpop.f32.mrb[52].mxu1 }
 0x3af   : > { %v4302_v58 = vadd.f32 %v5359_v14, %v7372_v34  ;;  %v4293_v57 = vpop.f32.mrb[53].mxu1 }
 0x3b0   : > { %v4294_v52 = vadd.f32 %v7372_v34, %v4293_v57  ;;  %v5360_v46 = vpop.f32.mrb[54].mxu1 }
 0x3b1   : > { %4390 = vst [vmem:[%s7376_s28 + $0x90] sm:$0xff] %v4302_v58  ;;  %v4305_v25 = vadd.f32 %v5360_v46, %v7372_v34  ;;  %v4296_v0 = vpop.f32.mrb[55].mxu1 }
 0x3b2   : > { %4388 = vst [vmem:[%s7376_s28 + $0x80] sm:$0xff] %v4294_v52  ;;  %v4297_v28 = vadd.f32 %v7372_v34, %v4296_v0 }
 0x3b3   : > { %4391 = vst [vmem:[%s7376_s28 + $0x98] sm:$0xff] %v4305_v25 }
 0x3b4   : > { %4389 = vst [vmem:[%s7376_s28 + $0x88] sm:$0xff] %v4297_v28 }
 0x3b6   : > { %v5363_v63 = vpop.f32.mrb[56].mxu1 }
 0x3b7   : > { %v4318_v9 = vadd.f32 %v5363_v63, %v7372_v34  ;;  %v4309_v7 = vpop.f32.mrb[57].mxu1 }
 0x3b8   : > { %v4310_v37 = vadd.f32 %v7372_v34, %v4309_v7  ;;  %v5364_v36 = vpop.f32.mrb[58].mxu1 }
 0x3b9   : > { %4394 = vst [vmem:[%s7376_s28 + $0xb0] sm:$0xff] %v4318_v9  ;;  %v4321_v59 = vadd.f32 %v5364_v36, %v7372_v34  ;;  %v4312_v48 = vpop.f32.mrb[59].mxu1 }
 0x3ba   : > { %4392 = vst [vmem:[%s7376_s28 + $0xa0] sm:$0xff] %v4310_v37  ;;  %v4313_v45 = vadd.f32 %v7372_v34, %v4312_v48 }
 0x3bb   : > { %4395 = vst [vmem:[%s7376_s28 + $0xb8] sm:$0xff] %v4321_v59 }
 0x3bc   : > { %4393 = vst [vmem:[%s7376_s28 + $0xa8] sm:$0xff] %v4313_v45 }
 0x3be   : > { %v5367_v16 = vpop.f32.mrb[60].mxu1 }
 0x3bf   : > { %v4334_v10 = vadd.f32 %v5367_v16, %v7372_v34  ;;  %v4325_v8 = vpop.f32.mrb[61].mxu1 }
 0x3c0   : > { %v4326_v61 = vadd.f32 %v7372_v34, %v4325_v8  ;;  %v5368_v4 = vpop.f32.mrb[62].mxu1 }
 0x3c1   : > { %4398 = vst [vmem:[%s7376_s28 + $0xd0] sm:$0xff] %v4334_v10  ;;  %v4337_v2 = vadd.f32 %v5368_v4, %v7372_v34  ;;  %v4328_v24 = vpop.f32.mrb[63].mxu1 }
 0x3c2   : > { %4396 = vst [vmem:[%s7376_s28 + $0xc0] sm:$0xff] %v4326_v61  ;;  %v4329_v18 = vadd.f32 %v7372_v34, %v4328_v24 }
 0x3c3   : > { %4399 = vst [vmem:[%s7376_s28 + $0xd8] sm:$0xff] %v4337_v2 }
 0x3c4   : > { %4397 = vst [vmem:[%s7376_s28 + $0xc8] sm:$0xff] %v4329_v18 }
 0x3c6   : > { %v5371_v33 = vpop.f32.mrb[64].mxu1 }
 0x3c7   : > { %v4350_v42 = vadd.f32 %v5371_v33, %v7372_v34  ;;  %v4341_v60 = vpop.f32.mrb[65].mxu1 }
 0x3c8   : > { %v4342_v17 = vadd.f32 %v7372_v34, %v4341_v60  ;;  %v5372_v26 = vpop.f32.mrb[66].mxu1 }
 0x3c9   : > { %4402 = vst [vmem:[%s7376_s28 + $0xf0] sm:$0xff] %v4350_v42  ;;  %v4353_v62 = vadd.f32 %v5372_v26, %v7372_v34  ;;  %v4344_v39 = vpop.f32.mrb[67].mxu1 }
 0x3ca   : > { %4400 = vst [vmem:[%s7376_s28 + $0xe0] sm:$0xff] %v4342_v17  ;;  %v4345_v50 = vadd.f32 %v7372_v34, %v4344_v39 }
 0x3cb   : > { %4403 = vst [vmem:[%s7376_s28 + $0xf8] sm:$0xff] %v4353_v62 }
 0x3cc   : > { %4401 = vst [vmem:[%s7376_s28 + $0xe8] sm:$0xff] %v4345_v50 }
 0x3ce   : > { %v5375_v22 = vpop.f32.mrb[68].mxu1 }
 0x3cf   : > { %v4366_v19 = vadd.f32 %v5375_v22, %v7372_v34  ;;  %v4357_v43 = vpop.f32.mrb[69].mxu1 }
 0x3d0   : > { %v4358_v6 = vadd.f32 %v7372_v34, %v4357_v43  ;;  %v5376_v12 = vpop.f32.mrb[70].mxu1 }
 0x3d1   : > { %4406 = vst [vmem:[%s7376_s28 + $0x110] sm:$0xff] %v4366_v19  ;;  %v4369_v31 = vadd.f32 %v5376_v12, %v7372_v34  ;;  %v4360_v35 = vpop.f32.mrb[71].mxu1 }
 0x3d2   : > { %4404 = vst [vmem:[%s7376_s28 + $0x100] sm:$0xff] %v4358_v6  ;;  %v4361_v47 = vadd.f32 %v7372_v34, %v4360_v35 }
 0x3d3   : > { %4407 = vst [vmem:[%s7376_s28 + $0x118] sm:$0xff] %v4369_v31 }
 0x3d4   : > { %4405 = vst [vmem:[%s7376_s28 + $0x108] sm:$0xff] %v4361_v47 }
 0x3d5   : > { %6019 = shalt.err (!%p6016_p0)
}
 0x3d6   : > { %s6020_s16 = scalar_lea.hbm %s7449_s12, 4608  ;;  %s6024_s10 = scalar_lea.hbm %s7509_s5, 9216 }
 0x3d7   : > { %p6021_p4 = scmp.ne.s32.totalorder %s7449_s12, %s6020_s16  ;;  %p6025_p12 = scmp.lt.u32.totalorder %s7449_s12, %s7509_s5 }
 0x3d8   : > { %p6026_p1 = scmp.lt.u32.totalorder %s6024_s10, %s6020_s16  ;;  %p6028_p2 = scmp.lt.u32.totalorder %s6020_s16, %s7449_s12 }
 0x3d9   : > { %p6022_p13 = pnand %p6021_p4, %p6317_p5 }
 0x3da   : > { %p6027_p11 = por %p6026_p1, %p6025_p12 }
 0x3db   : > { %p6023_p6 = pneg %p6022_p13 }
 0x3dc   : > { %p6029_p8 = por %p6028_p2, %p6027_p11 }
 0x3de   : > { %p6030_p10 = pnand %p6029_p8, %p6023_p6 }
 0x3e0   : > { %6033 = shalt.err (!%p6030_p10)
}
 0x3e1   : > { %s6107_s28 = smov 128   ;;  %s6108_s30 = smov 8  }
 0x3e2   : > { %5697 = dma.vmem_to_hbm [thread:$0]  (%p6317_p5), %s7451_s11, 4608, %s7449_s12, %s4409_s21, %s6107_s28, %s6107_s28, %s6108_s30  }
 0x3e3 PF: > { %s7538_s13 = sld [smem:[#allocation17_spill]]  ;;  %s7539_s6 = sld [smem:[#allocation18_spill]] }
 0x3e4   : > { %p7541_p7 = scmp.ge.s32.totalorder %s6096_s23, 2 }
 0x3e9   : > { %s4437_s29 = sand.u32 1, %s7538_s13   ;;  %p7540_p3 = scmp.ne.s32.totalorder %s7539_s6, 0 }
 0x3ea   : > { %s4438_s14 = scalar_lea.sflag [#allocation5], %s4437_s29 }
 0x3eb   : > { %p5717_p9 = pnand %p7541_p7, %p7540_p3 }
 0x3ed   : > { %6071 = dma.done.wait (!%p5717_p9), %s4438_s14, 4608  }
 0x3ee   : > { %6073 = vsyncadd (!%p5717_p9), %s4438_s14, 4294962688  ;;  %s23_s23 = sadd.s32 1, %s6096_s23   ;;  %s7542_s18 = smov %s6080_s19 }
 0x3ef   : > { %p20_p0 = scmp.ge.s32.totalorder %s23_s23, 4   ;;  %s7543_s19 = smov %s6084_s20 }
 0x3f0   : > { %s7544_s20 = smov %s6329_s9  ;;  %s7545_s21 = smov %s6092_s22 }
 0x3f1   : > { %s7546_s22 = smov %s7548_s24  ;;  %22 = sbr.rel (!%p20_p0) target bundleno = 8 (0x8), region = 118 }
 0x3f8   :  { %4443 = vsyncpa [#allocation4], 1 }
 0x3f9   :  { %4445 = vsyncpa [#allocation4 + $0x1], 1 }
 0x3fa   :  { %4446 = vsyncpa [#allocation7], 1 }
 0x3fb   :  { %4447 = vsyncpa [#allocation10], 1 }
 0x3fc   :  { %4448 = vsyncpa [#allocation5], 1 }
 0x3fd   :  { %4450 = vsyncpa [#allocation5 + $0x1], 1 }

</bundles_post_ra>
